<compile_context>
chip_gen: v6e
topology: v6e:2x2x1
jax: 0.10.0
libtpu: 0.0.40
codegen_flags: <defaults>
</compile_context>

<pallas_src>
import functools

import jax
import jax.numpy as jnp
from jax import lax
from jax.experimental import pallas as pl
from jax.experimental.pallas import tpu as pltpu


# ---------------------------------------------------------------------------
# Fused per-layer kernel, G batch elements per grid step:
#   [d_q ; d_k] -> Linear -> ReLU -> Linear -> L2-normalize -> PatchNCE -> per-batch loss sum
# ---------------------------------------------------------------------------
def _ccpl_layer_kernel(dq_ref, dk_ref, w1_ref, b1_ref, w2_ref, b2_ref, loss_ref,
                       *, G, S, tau):
    # dq_ref/dk_ref: (G, S, Cin) bf16   w1: (Cin, Cin) bf16   b1: (1, Cin) f32
    # w2: (Cin, Cout) bf16              b2: (1, Cout) f32
    # loss_ref: (G, 1, 1) f32 -- per-batch SUM of the S per-row cross-entropy losses
    Cin = dq_ref.shape[-1]
    GS = G * S

    # Stack q and k rows in VMEM (no HBM concat): 2*G*S rows fill the MXU row dimension.
    dq = dq_ref[...].reshape(GS, Cin)
    dk = dk_ref[...].reshape(GS, Cin)
    x = jnp.concatenate([dq, dk], axis=0)                               # (2GS, Cin) bf16

    # --- 2-layer MLP: bf16 MXU operands, f32 accumulation / post-matmul math ---
    h = jnp.dot(x, w1_ref[...], preferred_element_type=jnp.float32) + b1_ref[...]
    h = jnp.maximum(h, 0.0)                                             # ReLU (f32)
    y = jnp.dot(h.astype(jnp.bfloat16), w2_ref[...],
                preferred_element_type=jnp.float32) + b2_ref[...]       # (2GS, Cout) f32

    # --- Normalize(2): single exact rsqrt (one EUP op).  torch uses x/(||x||+1e-7); the
    #     difference vs x*rsqrt(sumsq) is O(1e-7) relative and negligible. ---
    sumsq = jnp.sum(y * y, axis=-1, keepdims=True)                      # (2GS, 1)
    f = y * lax.rsqrt(sumsq + 1e-14)                                    # (2GS, Cout) f32

    inv_tau = jnp.float32(1.0 / tau)

    # Per-batch PatchNCE (G is 1 or 2 -> static unroll).  Logit math stays f32.
    for g in range(G):
        fq = f[g * S:(g + 1) * S, :]                                    # (S, Cout)
        fk = f[GS + g * S:GS + (g + 1) * S, :]                          # (S, Cout)

        # l_neg[i, j] = f_q[i, :] . f_k[j, :]   (contraction over the channel/lane dim)
        # TODO(synk): check with pl.lower_as_mlir whether this NT contraction inserts an
        #             extra vxpose; if so, pre-transpose fk once and use a plain jnp.dot.
        l_neg = lax.dot_general(fq, fk, (((1,), (1,)), ((), ())),
                                preferred_element_type=jnp.float32) * inv_tau   # (S, S)
        # l_pos[i] = f_q[i, :] . f_k[i, :]  (== diag(l_neg) up to fp accumulation order)
        l_pos = jnp.sum(fq * fk, axis=-1, keepdims=True) * inv_tau              # (S, 1)

        # Cross-entropy with target 0 of logits [l_pos, l_neg(diag -> -inf)].  Because
        # diag(l_neg) == l_pos, the masked diagonal term and the l_pos term are the same
        # element, so the softmax denominator is just the full row sum of exp(l_neg); the
        # -inf mask / iota construction is dropped on purpose (documented approximation).
        m = jnp.maximum(jnp.max(l_neg, axis=-1, keepdims=True), l_pos)          # (S, 1)
        denom = jnp.sum(jnp.exp(l_neg - m), axis=-1, keepdims=True)             # (S, 1)
        loss_rows = m + jnp.log(denom) - l_pos                                  # (S, 1)

        # In-kernel reduction to one scalar per batch element (no lane-sparse row store).
        loss_ref[g] = jnp.sum(loss_rows, keepdims=True)                         # (1, 1)


def _batches_per_step(B):
    """Batch elements folded per grid step: MXU row fill vs. TensorCore parallelism."""
    try:
        kind = jax.devices()[0].device_kind.lower()
    except Exception:
        kind = ""
    if B % 2 == 0:
        if "v6" in kind:                 # v6e: 1 TC, 256-row MXU -> 2 batches = 256 rows
            return 2
        if "v7" in kind and B >= 4:      # v7x: keep >=2 parallel steps for the 2 TCs
            return 2
    return 1                             # v5e (128-row MXU) / odd B / small-B v7x


def ccpl_layer_loss(d_q, d_k, w1, b1, w2, b2, tau=0.07):
    """Fused MLP(q) + MLP(k) + PatchNCE for one layer. Returns the mean CE loss."""
    B, S, Cin = d_q.shape
    Cout = w2.shape[1]
    G = _batches_per_step(B)

    # bf16 MXU operands (converted once in the wrapper; accumulation stays f32 in-kernel).
    dq16 = d_q.astype(jnp.bfloat16)
    dk16 = d_k.astype(jnp.bfloat16)
    w1_16 = w1.astype(jnp.bfloat16)
    w2_16 = w2.astype(jnp.bfloat16)

    rows = 2 * S * B
    cost = pl.CostEstimate(
        flops=2 * rows * Cin * (Cin + Cout) + 2 * B * S * S * Cout + 6 * rows * Cout,
        transcendentals=rows + B * S * (S + 1),            # rsqrt + exp + log
        bytes_accessed=2 * rows * Cin * 2                   # d_q + d_k (bf16)
                       + (Cin * Cin + Cin * Cout) * 2       # w1 + w2 (bf16)
                       + (Cin + Cout) * 4 + B * 4,          # biases + per-batch losses
    )

    per_batch = pl.pallas_call(
        functools.partial(_ccpl_layer_kernel, G=G, S=S, tau=tau),
        out_shape=jax.ShapeDtypeStruct((B, 1, 1), jnp.float32),
        grid=(B // G,),
        in_specs=[
            pl.BlockSpec((G, S, Cin), lambda b: (b, 0, 0)),
            pl.BlockSpec((G, S, Cin), lambda b: (b, 0, 0)),
            # TODO(synk): pipeline_mode=pl.Buffered(1) on these constant-index weight
            #             blocks would halve their VMEM residency for the Cin=512 layer.
            pl.BlockSpec((Cin, Cin), lambda b: (0, 0)),
            pl.BlockSpec((1, Cin), lambda b: (0, 0)),
            pl.BlockSpec((Cin, Cout), lambda b: (0, 0)),
            pl.BlockSpec((1, Cout), lambda b: (0, 0)),
        ],
        out_specs=pl.BlockSpec((G, 1, 1), lambda b: (b, 0, 0)),
        # "parallel" so both TensorCores get work on v7x.
        compiler_params=pltpu.CompilerParams(dimension_semantics=("parallel",)),
        cost_estimate=cost,
    )(dq16, dk16, w1_16, b1, w2_16, b2)

    # CrossEntropyLoss default reduction='mean' over the B*S rows.
    return jnp.sum(per_batch) / (B * S)


# ---------------------------------------------------------------------------
# NeighborSample glue (index generation + gather stay in plain JAX / XLA)
# TODO(synk): optionally move the NCHW->NHWC gather into the kernel via
#             PrefetchScalarGridSpec / in-kernel DMA gather for large feature maps.
# ---------------------------------------------------------------------------
def neighbor_sample_ids(key, h, w, num_s):
    # TODO(synk): torch.randperm replaced by jax.random.permutation (different RNG stream)
    n_interior = (h - 2) * (w - 2)
    s_ids = jax.random.permutation(key, n_interior)
    k = int(min(num_s, n_interior))
    s_ids = s_ids[:k]
    ch_ids = s_ids // (w - 2) + 1
    cw_ids = s_ids % (w - 2) + 1
    c_ids = jnp.tile(ch_ids * w + cw_ids, 8)                            # (8*k,)
    dic = [-(w + 1), -w, -(w - 1), -1, 1, w - 1, w, w + 1]
    delta = jnp.repeat(jnp.asarray(dic, dtype=c_ids.dtype), k)
    n_ids = c_ids + delta
    return c_ids, n_ids


def neighbor_sample_feat_d(feat_nchw, c_ids, n_ids):
    b, c, h, w = feat_nchw.shape
    feat_r = jnp.transpose(feat_nchw, (0, 2, 3, 1)).reshape(b, h * w, c)
    feat_c = feat_r[:, c_ids, :]
    feat_n = feat_r[:, n_ids, :]
    return feat_c - feat_n                                              # (B, 8*k, C)


# ---------------------------------------------------------------------------
# CCPL forward (all layers inside one jit so weight converts / DMAs / launches overlap)
# ---------------------------------------------------------------------------
def ccpl_forward(params, feats_q, feats_k, num_s, start_layer, end_layer, key, tau=0.07):
    loss_ccp = jnp.float32(0.0)
    for i in range(start_layer, end_layer):
        _, _, h, w = feats_q[i].shape
        key, sub = jax.random.split(key)
        c_ids, n_ids = neighbor_sample_ids(sub, h, w, num_s)
        d_q = neighbor_sample_feat_d(feats_q[i], c_ids, n_ids)
        d_k = neighbor_sample_feat_d(feats_k[i], c_ids, n_ids)
        w1, b1, w2, b2 = params[i]
        loss_ccp = loss_ccp + ccpl_layer_loss(d_q, d_k, w1, b1, w2, b2, tau)
    return loss_ccp


ccpl_forward_jit = jax.jit(ccpl_forward, static_argnums=(3, 4, 5))


# Pure-JAX f32 reference (mirrors the PyTorch code path) for sanity checking
def ccpl_reference(params, feats_q, feats_k, num_s, start_layer, end_layer, key, tau=0.07):
    total = jnp.float32(0.0)
    for i in range(start_layer, end_layer):
        _, _, h, w = feats_q[i].shape
        key, sub = jax.random.split(key)
        c_ids, n_ids = neighbor_sample_ids(sub, h, w, num_s)
        w1, b1, w2, b2 = params[i]

        def enc(feat):
            d = neighbor_sample_feat_d(feat, c_ids, n_ids)
            y = jnp.maximum(d @ w1 + b1[0], 0.0) @ w2 + b2[0]
            nrm = jnp.sqrt(jnp.sum(y * y, axis=-1, keepdims=True))
            return y / (nrm + 1e-7)                                     # (B, S, C)

        gq, gk = enc(feats_q[i]), enc(feats_k[i])
        B, S, C = gq.shape
        l_neg = jnp.einsum("bic,bjc->bij", gq, gk) / tau
        l_pos = jnp.sum(gq * gk, axis=-1) / tau
        eye = jnp.eye(S, dtype=bool)[None]
        neg = jnp.where(eye, -jnp.inf, l_neg)
        logits = jnp.concatenate([l_pos[..., None], neg], axis=-1)
        lse = jax.scipy.special.logsumexp(logits, axis=-1)
        total = total + jnp.mean(lse - l_pos)
    return total


def init_mlp_params(key):
    # mlp ModuleList: per layer i -> Linear(c_in, c_in), ReLU, Linear(c_in, c_out)
    c_ins = [64, 128, 256, 512]
    c_outs = [16, 32, 64, 128]
    params = []
    for i, (ci, co) in enumerate(zip(c_ins, c_outs)):
        k1, k2, k3, k4, key = jax.random.split(key, 5)
        bnd1 = 1.0 / jnp.sqrt(ci)
        w1 = jax.random.uniform(k1, (ci, ci), jnp.float32, -bnd1, bnd1)
        b1 = jax.random.uniform(k2, (1, ci), jnp.float32, -bnd1, bnd1)
        w2 = jax.random.uniform(k3, (ci, co), jnp.float32, -bnd1, bnd1)
        b2 = jax.random.uniform(k4, (1, co), jnp.float32, -bnd1, bnd1)
        params.append((w1, b1, w2, b2))
    return params


if __name__ == "__main__":
    key = jax.random.PRNGKey(0)
    kp, kq0, kq1, kk0, kk1, ksample = jax.random.split(key, 6)

    params = init_mlp_params(kp)

    B = 2
    num_s = 8          # -> S = 8 * num_s = 64 sampled differences per image
    start_layer, end_layer = 0, 2

    # feats follow the VGG-ish channel progression used by the mlp: layer0 C=64, layer1 C=128
    feats_q = [
        jax.random.normal(kq0, (B, 64, 16, 16), jnp.float32),
        jax.random.normal(kq1, (B, 128, 8, 8), jnp.float32),
    ]
    feats_k = [
        jax.random.normal(kk0, (B, 64, 16, 16), jnp.float32),
        jax.random.normal(kk1, (B, 128, 8, 8), jnp.float32),
    ]

    loss = ccpl_forward_jit(params, feats_q, feats_k, num_s, start_layer, end_layer, ksample)
    loss = jax.block_until_ready(loss)

    ref = ccpl_reference(params, feats_q, feats_k, num_s, start_layer, end_layer, ksample)
    ref = jax.block_until_ready(ref)

    assert jnp.isfinite(loss), "non-finite loss"
    # bf16 MXU operands (amplified ~1/tau in the logits) -> allow ~2% relative slack vs.
    # the pure-f32 reference; genuine kernel bugs show up as O(1)+ differences.
    tol = 1e-2 + 2e-2 * abs(float(ref))
    assert abs(float(loss) - float(ref)) < tol, (float(loss), float(ref))
    print("KERNEL_OK")
</pallas_src>

<mosaic_0001>
module attributes {stable_mosaic.version = 11 : i64} {
  func.func @_ccpl_layer_kernel(%arg0: i32, %arg1: memref<1x64x128xbf16, #tpu.memory_space<vmem>>, %arg2: memref<1x64x128xbf16, #tpu.memory_space<vmem>>, %arg3: memref<128x128xbf16, #tpu.memory_space<vmem>>, %arg4: memref<1x128xf32, #tpu.memory_space<vmem>>, %arg5: memref<128x32xbf16, #tpu.memory_space<vmem>>, %arg6: memref<1x32xf32, #tpu.memory_space<vmem>>, %arg7: memref<1x1x1xf32, #tpu.memory_space<vmem>>) attributes {dimension_semantics = [#tpu.dimension_semantics<parallel>], iteration_bounds = array<i64: 2>, scalar_prefetch = 0 : i64, scratch_operands = 0 : i64, tpu.core_type = #tpu.core_type<tc>, window_params = [{transform_indices = @transform_0, window_bounds = array<i64: 1, 64, 128>}, {transform_indices = @transform_1, window_bounds = array<i64: 1, 64, 128>}, {pipeline_mode = #tpu.pipeline_mode<synchronous>, transform_indices = @transform_2, window_bounds = array<i64: 128, 128>}, {pipeline_mode = #tpu.pipeline_mode<synchronous>, transform_indices = @transform_3, window_bounds = array<i64: 1, 128>}, {pipeline_mode = #tpu.pipeline_mode<synchronous>, transform_indices = @transform_4, window_bounds = array<i64: 128, 32>}, {pipeline_mode = #tpu.pipeline_mode<synchronous>, transform_indices = @transform_5, window_bounds = array<i64: 1, 32>}, {transform_indices = @transform_6, window_bounds = array<i64: 1, 1, 1>}]} {
    %c0 = arith.constant 0 : index
    %c0_0 = arith.constant 0 : index
    %c0_1 = arith.constant 0 : index
    %0 = vector.load %arg1[%c0, %c0_0, %c0_1] : memref<1x64x128xbf16, #tpu.memory_space<vmem>>, vector<1x64x128xbf16>
    %1 = vector.shape_cast %0 : vector<1x64x128xbf16> to vector<64x128xbf16>
    %c0_2 = arith.constant 0 : index
    %c0_3 = arith.constant 0 : index
    %c0_4 = arith.constant 0 : index
    %2 = vector.load %arg2[%c0_2, %c0_3, %c0_4] : memref<1x64x128xbf16, #tpu.memory_space<vmem>>, vector<1x64x128xbf16>
    %3 = vector.shape_cast %2 : vector<1x64x128xbf16> to vector<64x128xbf16>
    %4 = tpu.concatenate %1, %3 in 0 : vector<64x128xbf16>, vector<64x128xbf16> -> vector<128x128xbf16>
    %c0_5 = arith.constant 0 : index
    %c0_6 = arith.constant 0 : index
    %5 = vector.load %arg3[%c0_5, %c0_6] : memref<128x128xbf16, #tpu.memory_space<vmem>>, vector<128x128xbf16>
    %cst = arith.constant dense<0.000000e+00> : vector<128x128xf32>
    %6 = tpu.matmul %4, %5, %cst {dimension_numbers = #tpu.dot_dimension_numbers<[1], [0], [0], [1], [0, 0, 1, 1], [], []>} : vector<128x128xbf16>, vector<128x128xbf16>, vector<128x128xf32> -> vector<128x128xf32>
    %c0_7 = arith.constant 0 : index
    %c0_8 = arith.constant 0 : index
    %7 = vector.load %arg4[%c0_7, %c0_8] : memref<1x128xf32, #tpu.memory_space<vmem>>, vector<1x128xf32>
    %8 = vector.broadcast %7 : vector<1x128xf32> to vector<128x128xf32>
    %9 = arith.addf %6, %8 : vector<128x128xf32>
    %cst_9 = arith.constant 0.000000e+00 : f32
    %10 = vector.broadcast %cst_9 : f32 to vector<128x128xf32>
    %11 = arith.maximumf %9, %10 : vector<128x128xf32>
    %12 = arith.truncf %11 : vector<128x128xf32> to vector<128x128xbf16>
    %c0_10 = arith.constant 0 : index
    %c0_11 = arith.constant 0 : index
    %13 = vector.load %arg5[%c0_10, %c0_11] : memref<128x32xbf16, #tpu.memory_space<vmem>>, vector<128x32xbf16>
    %cst_12 = arith.constant dense<0.000000e+00> : vector<128x32xf32>
    %14 = tpu.matmul %12, %13, %cst_12 {dimension_numbers = #tpu.dot_dimension_numbers<[1], [0], [0], [1], [0, 0, 1, 1], [], []>} : vector<128x128xbf16>, vector<128x32xbf16>, vector<128x32xf32> -> vector<128x32xf32>
    %c0_13 = arith.constant 0 : index
    %c0_14 = arith.constant 0 : index
    %15 = vector.load %arg6[%c0_13, %c0_14] : memref<1x32xf32, #tpu.memory_space<vmem>>, vector<1x32xf32>
    %16 = vector.broadcast %15 : vector<1x32xf32> to vector<128x32xf32>
    %17 = arith.addf %14, %16 : vector<128x32xf32>
    %18 = arith.mulf %17, %17 : vector<128x32xf32>
    %cst_15 = arith.constant dense<0.000000e+00> : vector<128xf32>
    %19 = vector.multi_reduction <add>, %18, %cst_15 [1] : vector<128x32xf32> to vector<128xf32>
    %20 = vector.shape_cast %19 : vector<128xf32> to vector<128x1xf32>
    %cst_16 = arith.constant 9.99999982E-15 : f32
    %21 = vector.broadcast %cst_16 : f32 to vector<128x1xf32>
    %22 = arith.addf %20, %21 : vector<128x1xf32>
    %23 = math.rsqrt %22 : vector<128x1xf32>
    %24 = vector.broadcast %23 : vector<128x1xf32> to vector<128x32xf32>
    %25 = arith.mulf %17, %24 : vector<128x32xf32>
    %26 = vector.extract_strided_slice %25 {offsets = [0, 0], sizes = [64, 32], strides = [1, 1]} : vector<128x32xf32> to vector<64x32xf32>
    %27 = vector.extract_strided_slice %25 {offsets = [64, 0], sizes = [64, 32], strides = [1, 1]} : vector<128x32xf32> to vector<64x32xf32>
    %cst_17 = arith.constant dense<0.000000e+00> : vector<64x64xf32>
    %28 = tpu.matmul %26, %27, %cst_17 {dimension_numbers = #tpu.dot_dimension_numbers<[1], [1], [0], [0], [0, 0, 1, 0], [], []>} : vector<64x32xf32>, vector<64x32xf32>, vector<64x64xf32> -> vector<64x64xf32>
    %cst_18 = arith.constant 14.2857141 : f32
    %29 = vector.broadcast %cst_18 : f32 to vector<64x64xf32>
    %30 = arith.mulf %28, %29 : vector<64x64xf32>
    %31 = arith.mulf %26, %27 : vector<64x32xf32>
    %cst_19 = arith.constant dense<0.000000e+00> : vector<64xf32>
    %32 = vector.multi_reduction <add>, %31, %cst_19 [1] : vector<64x32xf32> to vector<64xf32>
    %33 = vector.shape_cast %32 : vector<64xf32> to vector<64x1xf32>
    %cst_20 = arith.constant 14.2857141 : f32
    %34 = vector.broadcast %cst_20 : f32 to vector<64x1xf32>
    %35 = arith.mulf %33, %34 : vector<64x1xf32>
    %cst_21 = arith.constant dense<0xFF800000> : vector<64xf32>
    %36 = vector.multi_reduction <maximumf>, %30, %cst_21 [1] : vector<64x64xf32> to vector<64xf32>
    %37 = vector.shape_cast %36 : vector<64xf32> to vector<64x1xf32>
    %38 = arith.maximumf %37, %35 : vector<64x1xf32>
    %39 = vector.broadcast %38 : vector<64x1xf32> to vector<64x64xf32>
    %40 = arith.subf %30, %39 : vector<64x64xf32>
    %41 = math.exp %40 : vector<64x64xf32>
    %cst_22 = arith.constant dense<0.000000e+00> : vector<64xf32>
    %42 = vector.multi_reduction <add>, %41, %cst_22 [1] : vector<64x64xf32> to vector<64xf32>
    %43 = vector.shape_cast %42 : vector<64xf32> to vector<64x1xf32>
    %44 = math.log %43 : vector<64x1xf32>
    %45 = arith.addf %38, %44 : vector<64x1xf32>
    %46 = arith.subf %45, %35 : vector<64x1xf32>
    %47 = vector.shape_cast %46 : vector<64x1xf32> to vector<1x64x1xf32>
    %cst_23 = arith.constant dense<0.000000e+00> : vector<1xf32>
    %48 = vector.multi_reduction <add>, %47, %cst_23 [1, 2] : vector<1x64x1xf32> to vector<1xf32>
    %49 = vector.shape_cast %48 : vector<1xf32> to vector<1x1x1xf32>
    %50 = vector.extract %49[0, 0, 0] : f32 from vector<1x1x1xf32>
    %51 = vector.broadcast %50 : f32 to vector<1x1xf32>
    %c0_24 = arith.constant 0 : index
    %c0_25 = arith.constant 0 : index
    %c0_26 = arith.constant 0 : index
    %52 = vector.load %arg7[%c0_24, %c0_25, %c0_26] : memref<1x1x1xf32, #tpu.memory_space<vmem>>, vector<1x1x1xf32>
    %53 = vector.shape_cast %52 : vector<1x1x1xf32> to vector<1x1xf32>
    %54 = vector.shape_cast %51 : vector<1x1xf32> to vector<1x1x1xf32>
    tpu.vector_store %arg7[%c0_24, %c0_25, %c0_26], %54 {strides = array<i32>} : memref<1x1x1xf32, #tpu.memory_space<vmem>>, vector<1x1x1xf32>,
    return
  }
  func.func @transform_0(%arg0: i32) -> (i32, i32, i32) {
    %c0_i32 = arith.constant 0 : i32
    %c0_i32_0 = arith.constant 0 : i32
    %c0_i32_1 = arith.constant 0 : i32
    return %arg0, %c0_i32, %c0_i32_0 : i32, i32, i32
  }
  func.func @transform_1(%arg0: i32) -> (i32, i32, i32) {
    %c0_i32 = arith.constant 0 : i32
    %c0_i32_0 = arith.constant 0 : i32
    %c0_i32_1 = arith.constant 0 : i32
    return %arg0, %c0_i32, %c0_i32_0 : i32, i32, i32
  }
  func.func @transform_2(%arg0: i32) -> (i32, i32) {
    %c0_i32 = arith.constant 0 : i32
    %c0_i32_0 = arith.constant 0 : i32
    %c0_i32_1 = arith.constant 0 : i32
    return %c0_i32, %c0_i32_0 : i32, i32
  }
  func.func @transform_3(%arg0: i32) -> (i32, i32) {
    %c0_i32 = arith.constant 0 : i32
    %c0_i32_0 = arith.constant 0 : i32
    %c0_i32_1 = arith.constant 0 : i32
    return %c0_i32, %c0_i32_0 : i32, i32
  }
  func.func @transform_4(%arg0: i32) -> (i32, i32) {
    %c0_i32 = arith.constant 0 : i32
    %c0_i32_0 = arith.constant 0 : i32
    %c0_i32_1 = arith.constant 0 : i32
    return %c0_i32, %c0_i32_0 : i32, i32
  }
  func.func @transform_5(%arg0: i32) -> (i32, i32) {
    %c0_i32 = arith.constant 0 : i32
    %c0_i32_0 = arith.constant 0 : i32
    %c0_i32_1 = arith.constant 0 : i32
    return %c0_i32, %c0_i32_0 : i32, i32
  }
  func.func @transform_6(%arg0: i32) -> (i32, i32, i32) {
    %c0_i32 = arith.constant 0 : i32
    %c0_i32_0 = arith.constant 0 : i32
    %c0_i32_1 = arith.constant 0 : i32
    return %arg0, %c0_i32, %c0_i32_0 : i32, i32, i32
  }
}

module attributes {stable_mosaic.version = 11 : i64} {
  func.func @_ccpl_layer_kernel(%arg0: i32, %arg1: memref<1x64x64xbf16, #tpu.memory_space<vmem>>, %arg2: memref<1x64x64xbf16, #tpu.memory_space<vmem>>, %arg3: memref<64x64xbf16, #tpu.memory_space<vmem>>, %arg4: memref<1x64xf32, #tpu.memory_space<vmem>>, %arg5: memref<64x16xbf16, #tpu.memory_space<vmem>>, %arg6: memref<1x16xf32, #tpu.memory_space<vmem>>, %arg7: memref<1x1x1xf32, #tpu.memory_space<vmem>>) attributes {dimension_semantics = [#tpu.dimension_semantics<parallel>], iteration_bounds = array<i64: 2>, scalar_prefetch = 0 : i64, scratch_operands = 0 : i64, tpu.core_type = #tpu.core_type<tc>, window_params = [{transform_indices = @transform_0, window_bounds = array<i64: 1, 64, 64>}, {transform_indices = @transform_1, window_bounds = array<i64: 1, 64, 64>}, {pipeline_mode = #tpu.pipeline_mode<synchronous>, transform_indices = @transform_2, window_bounds = array<i64: 64, 64>}, {pipeline_mode = #tpu.pipeline_mode<synchronous>, transform_indices = @transform_3, window_bounds = array<i64: 1, 64>}, {pipeline_mode = #tpu.pipeline_mode<synchronous>, transform_indices = @transform_4, window_bounds = array<i64: 64, 16>}, {pipeline_mode = #tpu.pipeline_mode<synchronous>, transform_indices = @transform_5, window_bounds = array<i64: 1, 16>}, {transform_indices = @transform_6, window_bounds = array<i64: 1, 1, 1>}]} {
    %c0 = arith.constant 0 : index
    %c0_0 = arith.constant 0 : index
    %c0_1 = arith.constant 0 : index
    %0 = vector.load %arg1[%c0, %c0_0, %c0_1] : memref<1x64x64xbf16, #tpu.memory_space<vmem>>, vector<1x64x64xbf16>
    %1 = vector.shape_cast %0 : vector<1x64x64xbf16> to vector<64x64xbf16>
    %c0_2 = arith.constant 0 : index
    %c0_3 = arith.constant 0 : index
    %c0_4 = arith.constant 0 : index
    %2 = vector.load %arg2[%c0_2, %c0_3, %c0_4] : memref<1x64x64xbf16, #tpu.memory_space<vmem>>, vector<1x64x64xbf16>
    %3 = vector.shape_cast %2 : vector<1x64x64xbf16> to vector<64x64xbf16>
    %4 = tpu.concatenate %1, %3 in 0 : vector<64x64xbf16>, vector<64x64xbf16> -> vector<128x64xbf16>
    %c0_5 = arith.constant 0 : index
    %c0_6 = arith.constant 0 : index
    %5 = vector.load %arg3[%c0_5, %c0_6] : memref<64x64xbf16, #tpu.memory_space<vmem>>, vector<64x64xbf16>
    %cst = arith.constant dense<0.000000e+00> : vector<128x64xf32>
    %6 = tpu.matmul %4, %5, %cst {dimension_numbers = #tpu.dot_dimension_numbers<[1], [0], [0], [1], [0, 0, 1, 1], [], []>} : vector<128x64xbf16>, vector<64x64xbf16>, vector<128x64xf32> -> vector<128x64xf32>
    %c0_7 = arith.constant 0 : index
    %c0_8 = arith.constant 0 : index
    %7 = vector.load %arg4[%c0_7, %c0_8] : memref<1x64xf32, #tpu.memory_space<vmem>>, vector<1x64xf32>
    %8 = vector.broadcast %7 : vector<1x64xf32> to vector<128x64xf32>
    %9 = arith.addf %6, %8 : vector<128x64xf32>
    %cst_9 = arith.constant 0.000000e+00 : f32
    %10 = vector.broadcast %cst_9 : f32 to vector<128x64xf32>
    %11 = arith.maximumf %9, %10 : vector<128x64xf32>
    %12 = arith.truncf %11 : vector<128x64xf32> to vector<128x64xbf16>
    %c0_10 = arith.constant 0 : index
    %c0_11 = arith.constant 0 : index
    %13 = vector.load %arg5[%c0_10, %c0_11] : memref<64x16xbf16, #tpu.memory_space<vmem>>, vector<64x16xbf16>
    %cst_12 = arith.constant dense<0.000000e+00> : vector<128x16xf32>
    %14 = tpu.matmul %12, %13, %cst_12 {dimension_numbers = #tpu.dot_dimension_numbers<[1], [0], [0], [1], [0, 0, 1, 1], [], []>} : vector<128x64xbf16>, vector<64x16xbf16>, vector<128x16xf32> -> vector<128x16xf32>
    %c0_13 = arith.constant 0 : index
    %c0_14 = arith.constant 0 : index
    %15 = vector.load %arg6[%c0_13, %c0_14] : memref<1x16xf32, #tpu.memory_space<vmem>>, vector<1x16xf32>
    %16 = vector.broadcast %15 : vector<1x16xf32> to vector<128x16xf32>
    %17 = arith.addf %14, %16 : vector<128x16xf32>
    %18 = arith.mulf %17, %17 : vector<128x16xf32>
    %cst_15 = arith.constant dense<0.000000e+00> : vector<128xf32>
    %19 = vector.multi_reduction <add>, %18, %cst_15 [1] : vector<128x16xf32> to vector<128xf32>
    %20 = vector.shape_cast %19 : vector<128xf32> to vector<128x1xf32>
    %cst_16 = arith.constant 9.99999982E-15 : f32
    %21 = vector.broadcast %cst_16 : f32 to vector<128x1xf32>
    %22 = arith.addf %20, %21 : vector<128x1xf32>
    %23 = math.rsqrt %22 : vector<128x1xf32>
    %24 = vector.broadcast %23 : vector<128x1xf32> to vector<128x16xf32>
    %25 = arith.mulf %17, %24 : vector<128x16xf32>
    %26 = vector.extract_strided_slice %25 {offsets = [0, 0], sizes = [64, 16], strides = [1, 1]} : vector<128x16xf32> to vector<64x16xf32>
    %27 = vector.extract_strided_slice %25 {offsets = [64, 0], sizes = [64, 16], strides = [1, 1]} : vector<128x16xf32> to vector<64x16xf32>
    %cst_17 = arith.constant dense<0.000000e+00> : vector<64x64xf32>
    %28 = tpu.matmul %26, %27, %cst_17 {dimension_numbers = #tpu.dot_dimension_numbers<[1], [1], [0], [0], [0, 0, 1, 0], [], []>} : vector<64x16xf32>, vector<64x16xf32>, vector<64x64xf32> -> vector<64x64xf32>
    %cst_18 = arith.constant 14.2857141 : f32
    %29 = vector.broadcast %cst_18 : f32 to vector<64x64xf32>
    %30 = arith.mulf %28, %29 : vector<64x64xf32>
    %31 = arith.mulf %26, %27 : vector<64x16xf32>
    %cst_19 = arith.constant dense<0.000000e+00> : vector<64xf32>
    %32 = vector.multi_reduction <add>, %31, %cst_19 [1] : vector<64x16xf32> to vector<64xf32>
    %33 = vector.shape_cast %32 : vector<64xf32> to vector<64x1xf32>
    %cst_20 = arith.constant 14.2857141 : f32
    %34 = vector.broadcast %cst_20 : f32 to vector<64x1xf32>
    %35 = arith.mulf %33, %34 : vector<64x1xf32>
    %cst_21 = arith.constant dense<0xFF800000> : vector<64xf32>
    %36 = vector.multi_reduction <maximumf>, %30, %cst_21 [1] : vector<64x64xf32> to vector<64xf32>
    %37 = vector.shape_cast %36 : vector<64xf32> to vector<64x1xf32>
    %38 = arith.maximumf %37, %35 : vector<64x1xf32>
    %39 = vector.broadcast %38 : vector<64x1xf32> to vector<64x64xf32>
    %40 = arith.subf %30, %39 : vector<64x64xf32>
    %41 = math.exp %40 : vector<64x64xf32>
    %cst_22 = arith.constant dense<0.000000e+00> : vector<64xf32>
    %42 = vector.multi_reduction <add>, %41, %cst_22 [1] : vector<64x64xf32> to vector<64xf32>
    %43 = vector.shape_cast %42 : vector<64xf32> to vector<64x1xf32>
    %44 = math.log %43 : vector<64x1xf32>
    %45 = arith.addf %38, %44 : vector<64x1xf32>
    %46 = arith.subf %45, %35 : vector<64x1xf32>
    %47 = vector.shape_cast %46 : vector<64x1xf32> to vector<1x64x1xf32>
    %cst_23 = arith.constant dense<0.000000e+00> : vector<1xf32>
    %48 = vector.multi_reduction <add>, %47, %cst_23 [1, 2] : vector<1x64x1xf32> to vector<1xf32>
    %49 = vector.shape_cast %48 : vector<1xf32> to vector<1x1x1xf32>
    %50 = vector.extract %49[0, 0, 0] : f32 from vector<1x1x1xf32>
    %51 = vector.broadcast %50 : f32 to vector<1x1xf32>
    %c0_24 = arith.constant 0 : index
    %c0_25 = arith.constant 0 : index
    %c0_26 = arith.constant 0 : index
    %52 = vector.load %arg7[%c0_24, %c0_25, %c0_26] : memref<1x1x1xf32, #tpu.memory_space<vmem>>, vector<1x1x1xf32>
    %53 = vector.shape_cast %52 : vector<1x1x1xf32> to vector<1x1xf32>
    %54 = vector.shape_cast %51 : vector<1x1xf32> to vector<1x1x1xf32>
    tpu.vector_store %arg7[%c0_24, %c0_25, %c0_26], %54 {strides = array<i32>} : memref<1x1x1xf32, #tpu.memory_space<vmem>>, vector<1x1x1xf32>,
    return
  }
  func.func @transform_0(%arg0: i32) -> (i32, i32, i32) {
    %c0_i32 = arith.constant 0 : i32
    %c0_i32_0 = arith.constant 0 : i32
    %c0_i32_1 = arith.constant 0 : i32
    return %arg0, %c0_i32, %c0_i32_0 : i32, i32, i32
  }
  func.func @transform_1(%arg0: i32) -> (i32, i32, i32) {
    %c0_i32 = arith.constant 0 : i32
    %c0_i32_0 = arith.constant 0 : i32
    %c0_i32_1 = arith.constant 0 : i32
    return %arg0, %c0_i32, %c0_i32_0 : i32, i32, i32
  }
  func.func @transform_2(%arg0: i32) -> (i32, i32) {
    %c0_i32 = arith.constant 0 : i32
    %c0_i32_0 = arith.constant 0 : i32
    %c0_i32_1 = arith.constant 0 : i32
    return %c0_i32, %c0_i32_0 : i32, i32
  }
  func.func @transform_3(%arg0: i32) -> (i32, i32) {
    %c0_i32 = arith.constant 0 : i32
    %c0_i32_0 = arith.constant 0 : i32
    %c0_i32_1 = arith.constant 0 : i32
    return %c0_i32, %c0_i32_0 : i32, i32
  }
  func.func @transform_4(%arg0: i32) -> (i32, i32) {
    %c0_i32 = arith.constant 0 : i32
    %c0_i32_0 = arith.constant 0 : i32
    %c0_i32_1 = arith.constant 0 : i32
    return %c0_i32, %c0_i32_0 : i32, i32
  }
  func.func @transform_5(%arg0: i32) -> (i32, i32) {
    %c0_i32 = arith.constant 0 : i32
    %c0_i32_0 = arith.constant 0 : i32
    %c0_i32_1 = arith.constant 0 : i32
    return %c0_i32, %c0_i32_0 : i32, i32
  }
  func.func @transform_6(%arg0: i32) -> (i32, i32, i32) {
    %c0_i32 = arith.constant 0 : i32
    %c0_i32_0 = arith.constant 0 : i32
    %c0_i32_1 = arith.constant 0 : i32
    return %arg0, %c0_i32, %c0_i32_0 : i32, i32, i32
  }
}

</mosaic_0001>

<bundles_post_ra>
// kernel: tile.18
= control target key start
LH: loop header
LB: loop body
LE: loop exit
PB: predicated region body
PF: predicated region fallthrough
CT: control target
= control target key end

     0   :  { %s22_s0 = inlined_call_operand.vmem [shape: s32[8], index: 0, kind: input, shape index: {}]   ;;  %s23_s1 = inlined_call_operand.vmem [shape: s32[8,8], index: 1, kind: output, shape index: {}]  }
   0x1   :  { %v4_v0 = vld [vmem:[%s22_s0] ss:$0 sm:$0xff] }
   0x2   :  { %5 = vst [vmem:[%s23_s1] sm:$0xff] %v4_v0 }

// kernel: ccpl_forward.3
= control target key start
LH: loop header
LB: loop body
LE: loop exit
PB: predicated region body
PF: predicated region fallthrough
CT: control target
= control target key end

     0   :  { %s1559_s21 = smov 0   ;;  %s1921_s0 = inlined_call_operand.vmem [shape: bf16[2,64,128], index: 0, kind: input, shape index: {}]   ;;  %s1922_s1 = inlined_call_operand.vmem [shape: bf16[2,64,128], index: 1, kind: input, shape index: {}]   ;;  %s1923_s2 = inlined_call_operand.vmem [shape: bf16[128,128], index: 2, kind: input, shape index: {}]   ;;  %s1924_s3 = inlined_call_operand.vmem [shape: f32[1,128], index: 3, kind: input, shape index: {}]   ;;  %s1925_s4 = inlined_call_operand.vmem [shape: bf16[128,32], index: 4, kind: input, shape index: {}]   ;;  %s1926_s5 = inlined_call_operand.vmem [shape: f32[1,32], index: 5, kind: input, shape index: {}]   ;;  %s1927_s6 = inlined_call_operand.vmem [shape: f32[2,1,1], index: 6, kind: output, shape index: {}]  }
   0x1 LB: > { %s1207_s22 = sadd.s32 4294967295, %s1522_s21   ;;  %p1211_p0 = scmp.ge.s32.totalorder %s1522_s21, 1  ;;  %s1522_s21 = sphi %s1559_s21, %s16_s21  }
   0x2   : > { %p222_p1 = scmp.lt.s32.totalorder %s1522_s21, 3 }
   0x4   : > { %p223_p2 = pnand %p1211_p0, %p222_p1 }
   0x5   : > { %p255_p3 = scmp.lt.s32.totalorder (!%p223_p2), %s1207_s22, 1 }
   0x6   : > { %226 = sbr.rel (%p223_p2) target bundleno = 1405 (0x57d), region = 44 }
   0xb   : > { %v1428_v0 = vld [vmem:[%s1923_s2 + $0x38] sm:$0xff]   ;;  %v1429_v1 = vld [vmem:[%s1923_s2 + $0x30] sm:$0xff]   ;;  %s1929_s22 = smov (!%p255_p3, %s1207_s22), 1  ;;  %v1430_v2 = vld [vmem:[%s1923_s2 + $0x28] sm:$0xff]   ;;  %vm709_vm0 = vcmask 261120   ;;  %vm1007_vm1 = vcmask 523264  }
   0xc   : > { %1310 = vmatprep.subr.bf16.mxu0 %v1428_v0  ;;  %s1260_s29 = sshll.u32 %s1929_s22, 5  ;;  %v1431_v3 = vld [vmem:[%s1923_s2 + $0x20] sm:$0xff]   ;;  %v1432_v5 = vld [vmem:[%s1923_s2 + $0x18] sm:$0xff]   ;;  %v1433_v6 = vld [vmem:[%s1923_s2 + $0x10] sm:$0xff]   ;;  %vm1120_vm2 = vcmask 7168   ;;  %s267_s24 = scalar_lea.vmem %s1927_s6, %s1929_s22  ;;  %vm1146_vm3 = vcmask 0  }
   0xd   : > { %1311 = vmatpush3.bf16.msra.mxu0 %v1428_v0  ;;  %s1582_s8 = scalar_lea.vmem %s1921_s0, %s1260_s29  ;;  %s1591_s13 = scalar_lea.vmem %s1922_s1, %s1260_s29  ;;  %v1444_v7 = vld [vmem:[%s1925_s4 + $0x38] sm:$0xff]   ;;  %v1445_v8 = vld [vmem:[%s1925_s4 + $0x30] sm:$0xff]   ;;  %v1434_v9 = vld [vmem:[%s1923_s2 + $0x8] sm:$0xff]  }
   0xe   : > { %1312 = vmatprep.subr.bf16.mxu0 %v1429_v1  ;;  %v1436_v4 = vld [vmem:[%s1582_s8] sm:$0xff]   ;;  %1342 = vmatprep.subr.bf16.mxu1 %v1444_v7  ;;  %v1446_v10 = vld [vmem:[%s1925_s4 + $0x28] sm:$0xff]   ;;  %v1448_v13 = vld [vmem:[%s1925_s4 + $0x18] sm:$0xff]  }
   0xf   : > { %1326 = vmatprep.mubr.bf16.mxu0 %v1436_v4  ;;  %1343 = vmatpush3.bf16.msra.mxu1 %v1444_v7  ;;  %v1435_v11 = vld [vmem:[%s1923_s2] sm:$0xff]   ;;  %v1437_v14 = vld [vmem:[%s1582_s8 + $0x8] sm:$0xff]   ;;  %v1438_v15 = vld [vmem:[%s1582_s8 + $0x10] sm:$0xff]  }
  0x10   : > { %1344 = vmatprep.subr.bf16.mxu1 %v1445_v8  ;;  %v1447_v12 = vld [vmem:[%s1925_s4 + $0x20] sm:$0xff]   ;;  %v1439_v16 = vld [vmem:[%s1582_s8 + $0x18] sm:$0xff]   ;;  %v1441_v18 = vld [vmem:[%s1591_s13 + $0x8] sm:$0xff]  }
  0x11   : > { %1313 = vmatpush3.bf16.msra.mxu0 %v1429_v1  ;;  %v1440_v17 = vld [vmem:[%s1591_s13] sm:$0xff]   ;;  %v1442_v19 = vld [vmem:[%s1591_s13 + $0x10] sm:$0xff]   ;;  %v1443_v20 = vld [vmem:[%s1591_s13 + $0x18] sm:$0xff]  }
  0x12   : > { %1314 = vmatprep.subr.bf16.mxu0 %v1430_v2  ;;  %v1449_v21 = vld [vmem:[%s1925_s4 + $0x10] sm:$0xff]   ;;  %v1450_v22 = vld [vmem:[%s1925_s4 + $0x8] sm:$0xff]   ;;  %v1451_v23 = vld [vmem:[%s1925_s4] sm:$0xff]  }
  0x13   : > { %1345 = vmatpush3.bf16.msra.mxu1 %v1445_v8  ;;  %v1224_v26 = vld [vmem:[%s1924_s3] ss:$0 sm:$0xff] }
  0x14   : > { %1346 = vmatprep.subr.bf16.mxu1 %v1446_v10 }
  0x15   : > { %1315 = vmatpush3.bf16.msra.mxu0 %v1430_v2 }
  0x16   : > { %1316 = vmatprep.subr.bf16.mxu0 %v1431_v3 }
  0x17   : > { %1347 = vmatpush3.bf16.msra.mxu1 %v1446_v10 }
  0x18   : > { %1348 = vmatprep.subr.bf16.mxu1 %v1447_v12 }
  0x19   : > { %1317 = vmatpush3.bf16.msra.mxu0 %v1431_v3 }
  0x1a   : > { %1318 = vmatprep.subr.bf16.mxu0 %v1432_v5 }
  0x1b   : > { %1349 = vmatpush3.bf16.msra.mxu1 %v1447_v12 }
  0x1c   : > { %1350 = vmatprep.subr.bf16.mxu1 %v1448_v13 }
  0x1d   : > { %1319 = vmatpush3.bf16.msra.mxu0 %v1432_v5 }
  0x1e   : > { %1320 = vmatprep.subr.bf16.mxu0 %v1433_v6 }
  0x1f   : > { %1351 = vmatpush3.bf16.msra.mxu1 %v1448_v13 }
  0x20   : > { %1352 = vmatprep.subr.bf16.mxu1 %v1449_v21 }
  0x21   : > { %1321 = vmatpush3.bf16.msra.mxu0 %v1433_v6 }
  0x22   : > { %1322 = vmatprep.subr.bf16.mxu0 %v1434_v9 }
  0x23   : > { %1353 = vmatpush3.bf16.msra.mxu1 %v1449_v21 }
  0x24   : > { %1354 = vmatprep.subr.bf16.mxu1 %v1450_v22 }
  0x25   : > { %1323 = vmatpush3.bf16.msra.mxu0 %v1434_v9 }
  0x26   : > { %1324 = vmatprep.subr.bf16.mxu0 %v1435_v11 }
  0x27   : > { %1355 = vmatpush3.bf16.msra.mxu1 %v1450_v22 }
  0x28   : > { %1356 = vmatprep.subr.bf16.mxu1 %v1451_v23 }
  0x29   : > { %1325 = vmatpush3.bf16.msra.mxu0 %v1435_v11 }
  0x2b   : > { %1357 = vmatpush3.bf16.msra.mxu1 %v1451_v23 }
  0x2c   : > { %1327 = vmatmul.mubr.bf16.vlgmr.msra.gmra.mxu0 %v1437_v14 }
  0x2d   : > { %1330 = vmatprep.mubr.bf16.mxu0 %v1438_v15 }
  0x34   : > { %1331 = vmatmul.mubr.bf16.gmra.mxu0 %v1439_v16 }
  0x35   : > { %1334 = vmatprep.mubr.bf16.mxu0 %v1440_v17 }
  0x3c   : > { %1335 = vmatmul.mubr.bf16.gmra.mxu0 %v1441_v18 }
  0x3d   : > { %1338 = vmatprep.mubr.bf16.mxu0 %v1442_v19 }
  0x44   : > { %1339 = vmatmul.mubr.bf16.gmra.mxu0 %v1443_v20 }
  0xec   : > { %v1328_v24 = vpop.f32.mrf.mxu0 }
  0xed   : > { %v447_v30 = vadd.f32 %v1328_v24, %v1224_v26 }
  0xee   : > { %v438_v25 = vpop.f32.mrf.mxu0 }
  0xef   : > { %v439_v28 = vadd.f32 %v1224_v26, %v438_v25  ;;  %v503_v37 = vmax.f32 %v447_v30, 0.0 }
  0xf0   : > { %v1329_v27 = vpop.f32.mrf.mxu0 }
  0xf1   : > { %v450_v29 = vadd.f32 %v1329_v27, %v1224_v26  ;;  %v501_v35 = vmax.f32 %v439_v28, 0.0 }
  0xf2   : > { %v441_v31 = vpop.f32.mrf.mxu0 }
  0xf3   : > { %v442_v32 = vadd.f32 %v1224_v26, %v441_v31  ;;  %v504_v33 = vmax.f32 %v450_v29, 0.0  ;;  %v1233_v31 = vld [vmem:[%s1926_s5] ss:$0 sm:$0xff] }
  0xf4   : > { %v1332_v34 = vpop.f32.mrf.mxu0 }
  0xf5   : > { %v502_v36 = vmax.f32 %v442_v32, 0.0  ;;  %v518_v40 = vpack.c.bf16 %v504_v33, %v503_v37  ;;  %v463_v44 = vadd.f32 %v1332_v34, %v1224_v26 }
  0xf6   : > { %v454_v38 = vpop.f32.mrf.mxu0 }
  0xf7   : > { %v517_v39 = vpack.c.bf16 %v502_v36, %v501_v35  ;;  %v455_v42 = vadd.f32 %v1224_v26, %v454_v38  ;;  %v507_v51 = vmax.f32 %v463_v44, 0.0 }
  0xf8   : > { %v1333_v41 = vpop.f32.mrf.mxu0 }
  0xf9   : > { %v466_v43 = vadd.f32 %v1333_v41, %v1224_v26  ;;  %1358 = vmatprep.mubr.bf16.mxu1 %v517_v39  ;;  %v505_v49 = vmax.f32 %v455_v42, 0.0 }
  0xfa   : > { %v457_v45 = vpop.f32.mrf.mxu0  ;;  %1359 = vmatmul.mubr.bf16.vlgmr.msra.gmra.mxu1 %v518_v40 }
  0xfb   : > { %v458_v46 = vadd.f32 %v1224_v26, %v457_v45  ;;  %v508_v47 = vmax.f32 %v466_v43, 0.0 }
  0xfc   : > { %v1336_v48 = vpop.f32.mrf.mxu0 }
  0xfd   : > { %v506_v50 = vmax.f32 %v458_v46, 0.0  ;;  %v520_v54 = vpack.c.bf16 %v508_v47, %v507_v51  ;;  %v479_v58 = vadd.f32 %v1336_v48, %v1224_v26 }
  0xfe   : > { %v470_v52 = vpop.f32.mrf.mxu0 }
  0xff   : > { %v519_v53 = vpack.c.bf16 %v506_v50, %v505_v49  ;;  %v471_v56 = vadd.f32 %v1224_v26, %v470_v52  ;;  %v511_v1 = vmax.f32 %v479_v58, 0.0 }
 0x100   : > { %v1337_v55 = vpop.f32.mrf.mxu0 }
 0x101   : > { %v482_v57 = vadd.f32 %v1337_v55, %v1224_v26  ;;  %1362 = vmatprep.mubr.bf16.mxu1 %v519_v53  ;;  %v509_v63 = vmax.f32 %v471_v56, 0.0 }
 0x102   : > { %v473_v59 = vpop.f32.mrf.mxu0  ;;  %1363 = vmatmul.mubr.bf16.gmra.mxu1 %v520_v54 }
 0x103   : > { %v474_v60 = vadd.f32 %v1224_v26, %v473_v59  ;;  %v512_v61 = vmax.f32 %v482_v57, 0.0 }
 0x104   : > { %v1340_v62 = vpop.f32.mrf.mxu0 }
 0x105   : > { %v510_v0 = vmax.f32 %v474_v60, 0.0  ;;  %v522_v4 = vpack.c.bf16 %v512_v61, %v511_v1  ;;  %v495_v8 = vadd.f32 %v1340_v62, %v1224_v26 }
 0x106   : > { %v486_v2 = vpop.f32.mrf.mxu0 }
 0x107   : > { %v521_v3 = vpack.c.bf16 %v510_v0, %v509_v63  ;;  %v487_v6 = vadd.f32 %v1224_v26, %v486_v2  ;;  %v515_v14 = vmax.f32 %v495_v8, 0.0 }
 0x108   : > { %v1341_v5 = vpop.f32.mrf.mxu0 }
 0x109   : > { %v498_v7 = vadd.f32 %v1341_v5, %v1224_v26  ;;  %1366 = vmatprep.mubr.bf16.mxu1 %v521_v3  ;;  %v513_v12 = vmax.f32 %v487_v6, 0.0 }
 0x10a   : > { %v489_v9 = vpop.f32.mrf.mxu0  ;;  %1367 = vmatmul.mubr.bf16.gmra.mxu1 %v522_v4 }
 0x10b   : > { %v490_v10 = vadd.f32 %v1224_v26, %v489_v9  ;;  %v516_v11 = vmax.f32 %v498_v7, 0.0 }
 0x10d   : > { %v514_v13 = vmax.f32 %v490_v10, 0.0  ;;  %v524_v16 = vpack.c.bf16 %v516_v11, %v515_v14 }
 0x10f   : > { %v523_v15 = vpack.c.bf16 %v514_v13, %v513_v12 }
 0x111   : > { %1370 = vmatprep.mubr.bf16.mxu1 %v523_v15 }
 0x112   : > { %1371 = vmatmul.mubr.bf16.gmra.mxu1 %v524_v16 }
 0x1ba   : > { %v1360_v17 = vpop.f32.mrf.mxu1 }
 0x1bb   : > { %v1684_v58 = vadd.f32 %v1360_v17, %v1233_v31 }
 0x1bc   : > { %v630_v18 = vpop.f32.mrf.mxu1 }
 0x1bd   : > { %v1674_v52 = vadd.f32 %v1233_v31, %v630_v18  ;;  %v695_v2 = vmul.f32 %v1684_v58, %v1684_v58 }
 0x1be   : > { %v1361_v19 = vpop.f32.mrf.mxu1 }
 0x1bf   : > { %v693_v60 = vmul.f32 %v1674_v52, %v1674_v52  ;;  %v1689_v61 = vadd.f32 %v1361_v19, %v1233_v31  ;;  %v716_v7 = vsel %vm709_vm0, %v695_v2, 0.0 }
 0x1c0   : > { %v633_v20 = vpop.f32.mrf.mxu1 }
 0x1c1   : > { %v1679_v55 = vadd.f32 %v1233_v31, %v633_v20  ;;  %v710_v1 = vsel %vm709_vm0, %v693_v60, 0.0  ;;  %v696_v5 = vmul.f32 %v1689_v61, %v1689_v61 }
 0x1c2   : > { %v1364_v21 = vpop.f32.mrf.mxu1 }
 0x1c3   : > { %v694_v63 = vmul.f32 %v1679_v55, %v1679_v55  ;;  %v1704_v6 = vadd.f32 %v1364_v21, %v1233_v31  ;;  %v719_v10 = vsel %vm709_vm0, %v696_v5, 0.0 }
 0x1c4   : > { %v646_v22 = vpop.f32.mrf.mxu1 }
 0x1c5   : > { %v1694_v0 = vadd.f32 %v1233_v31, %v646_v22  ;;  %v713_v4 = vsel %vm709_vm0, %v694_v63, 0.0  ;;  %v699_v13 = vmul.f32 %v1704_v6, %v1704_v6 }
 0x1c6   : > { %v1365_v23 = vpop.f32.mrf.mxu1 }
 0x1c7   : > { %v697_v8 = vmul.f32 %v1694_v0, %v1694_v0  ;;  %v1709_v9 = vadd.f32 %v1365_v23, %v1233_v31  ;;  %v728_v16 = vsel %vm709_vm0, %v699_v13, 0.0 }
 0x1c8   : > { %v649_v24 = vpop.f32.mrf.mxu1 }
 0x1c9   : > { %v1699_v3 = vadd.f32 %v1233_v31, %v649_v24  ;;  %v722_v12 = vsel %vm709_vm0, %v697_v8, 0.0  ;;  %v700_v15 = vmul.f32 %v1709_v9, %v1709_v9 }
 0x1ca   : > { %v1368_v25 = vpop.f32.mrf.mxu1 }
 0x1cb   : > { %v1659_v43 = vadd.f32 %v1368_v25, %v1233_v31  ;;  %v698_v11 = vmul.f32 %v1699_v3, %v1699_v3  ;;  %v731_v17 = vsel %vm709_vm0, %v700_v15, 0.0 }
 0x1cc   : > { %v662_v27 = vpop.f32.mrf.mxu1 }
 0x1cd   : > { %v1669_v49 = vadd.f32 %v1233_v31, %v662_v27  ;;  %v703_v51 = vmul.f32 %v1659_v43, %v1659_v43  ;;  %v725_v14 = vsel %vm709_vm0, %v698_v11, 0.0 }
 0x1ce   : > { %v1369_v28 = vpop.f32.mrf.mxu1 }
 0x1cf   : > { %v1652_v39 = vadd.f32 %v1369_v28, %v1233_v31  ;;  %v740_v56 = vsel %vm709_vm0, %v703_v51, 0.0  ;;  %v701_v57 = vmul.f32 %v1669_v49, %v1669_v49 }
 0x1d0   : > { %v665_v26 = vpop.f32.mrf.mxu1 }
 0x1d1   : > { %v1664_v46 = vadd.f32 %v1233_v31, %v665_v26  ;;  %v704_v48 = vmul.f32 %v1652_v39, %v1652_v39  ;;  %v734_v62 = vsel %vm709_vm0, %v701_v57, 0.0 }
 0x1d2   : > { %v1372_v29 = vpop.f32.mrf.mxu1 }
 0x1d3   : > { %v1642_v33 = vadd.f32 %v1372_v29, %v1233_v31  ;;  %v743_v53 = vsel %vm709_vm0, %v704_v48, 0.0  ;;  %v702_v54 = vmul.f32 %v1664_v46, %v1664_v46 }
 0x1d4   : > { %v678_v30 = vpop.f32.mrf.mxu1 }
 0x1d5   : > { %v1646_v36 = vadd.f32 %v1233_v31, %v678_v30  ;;  %v707_v42 = vmul.f32 %v1642_v33, %v1642_v33  ;;  %v737_v59 = vsel %vm709_vm0, %v702_v54, 0.0 }
 0x1d6   : > { %v1373_v32 = vpop.f32.mrf.mxu1 }
 0x1d7   : > { %v1644_v34 = vadd.f32 %v1373_v32, %v1233_v31  ;;  %v705_v45 = vmul.f32 %v1646_v36, %v1646_v36  ;;  %v752_v47 = vsel %vm709_vm0, %v707_v42, 0.0 }
 0x1d8   : > { %v681_v35 = vpop.f32.mrf.mxu1 }
 0x1d9   : > { %v1648_v37 = vadd.f32 %v1233_v31, %v681_v35  ;;  %v708_v38 = vmul.f32 %v1644_v34, %v1644_v34  ;;  %v746_v50 = vsel %vm709_vm0, %v705_v45, 0.0 }
 0x1db   : > { %v755_v40 = vsel %vm709_vm0, %v708_v38, 0.0  ;;  %v706_v41 = vmul.f32 %v1648_v37, %v1648_v37 }
 0x1dc   : > { %756 = vadd.xlane.f32.xlu0 %v755_v40 }
 0x1dd   : > { %v749_v44 = vsel %vm709_vm0, %v706_v41, 0.0 }
 0x1de   : > { %750 = vadd.xlane.f32.xlu1 %v749_v44 }
 0x1e0   : > { %753 = vadd.xlane.f32.xlu0 %v752_v47 }
 0x1e2   : > { %747 = vadd.xlane.f32.xlu1 %v746_v50 }
 0x1e4   : > { %744 = vadd.xlane.f32.xlu0 %v743_v53 }
 0x1e6   : > { %741 = vadd.xlane.f32.xlu1 %v740_v56 }
 0x1e8   : > { %738 = vadd.xlane.f32.xlu0 %v737_v59 }
 0x1ea   : > { %735 = vadd.xlane.f32.xlu1 %v734_v62 }
 0x1ec   : > { %711 = vadd.xlane.f32.xlu0 %v710_v1 }
 0x1ee   : > { %714 = vadd.xlane.f32.xlu1 %v713_v4 }
 0x1f0   : > { %717 = vadd.xlane.f32.xlu0 %v716_v7 }
 0x1f2   : > { %720 = vadd.xlane.f32.xlu1 %v719_v10 }
 0x1f4   : > { %723 = vadd.xlane.f32.xlu0 %v722_v12 }
 0x1f6   : > { %726 = vadd.xlane.f32.xlu1 %v725_v14 }
 0x1f8   : > { %729 = vadd.xlane.f32.xlu0 %v728_v16 }
 0x1fa   : > { %732 = vadd.xlane.f32.xlu1 %v731_v17 }
 0x265   : > { %v757_v18 = vpop.xlane.xlu0 %756 }
 0x266   : > { %v773_v19 = vadd.f32 1e-14, %v757_v18 }
 0x267   : > { %v751_v20 = vpop.xlane.xlu1 %750 }
 0x268   : > { %1452 = vrsqrt.f32 %v773_v19  ;;  %v771_v21 = vadd.f32 1e-14, %v751_v20 }
 0x269   : > { %v754_v22 = vpop.xlane.xlu0 %753 }
 0x26a   : > { %v772_v23 = vadd.f32 1e-14, %v754_v22  ;;  %1454 = vrsqrt.f32 %v771_v21 }
 0x26b   : > { %v748_v24 = vpop.xlane.xlu1 %747 }
 0x26c   : > { %1456 = vrsqrt.f32 %v772_v23  ;;  %v770_v25 = vadd.f32 1e-14, %v748_v24 }
 0x26d   : > { %v745_v27 = vpop.xlane.xlu0 %744 }
 0x26e   : > { %1458 = vrsqrt.f32 %v770_v25  ;;  %v769_v26 = vadd.f32 1e-14, %v745_v27 }
 0x26f   : > { %v742_v28 = vpop.xlane.xlu1 %741 }
 0x270   : > { %v768_v30 = vadd.f32 1e-14, %v742_v28  ;;  %1460 = vrsqrt.f32 %v769_v26 }
 0x271   : > { %v739_v29 = vpop.xlane.xlu0 %738 }
 0x272   : > { %v767_v38 = vadd.f32 1e-14, %v739_v29  ;;  %1462 = vrsqrt.f32 %v768_v30 }
 0x273   : > { %v736_v31 = vpop.xlane.xlu1 %735 }
 0x274   : > { %v766_v42 = vadd.f32 1e-14, %v736_v31 }
 0x275   : > { %v1453_v32 = vpop.eup %1452  ;;  %v712_v35 = vpop.xlane.xlu0 %711 }
 0x276   : > { %v758_v40 = vadd.f32 1e-14, %v712_v35  ;;  %v1723_v41 = vmul.f32 %v1453_v32, %v1644_v34 }
 0x277   : > { %v715_v44 = vpop.xlane.xlu1 %714  ;;  %v1455_v45 = vpop.eup %1454 }
 0x278   : > { %1464 = vrsqrt.f32 %v758_v40  ;;  %1374 = vmatprep.subr.msk.mxu0 %vm709_vm0, %v1723_v41  ;;  %1402 = vmatprep.subr.msk.mxu1 %vm709_vm0, %v1723_v41  ;;  %v759_v48 = vadd.f32 1e-14, %v715_v44  ;;  %v1741_v56 = vmul.f32 %v1455_v45, %v1648_v37 }
 0x279   : > { %v1457_v47 = vpop.eup %1456  ;;  %1375 = vmatpush3.xpose.msk.msra.mxu0 %vm709_vm0, %v1723_v41  ;;  %1410 = vmatpush3.xpose.msk.msra.mxu1 %vm709_vm0, %v1723_v41  ;;  %v718_v34 = vpop.xlane.xlu0 %717  ;;  %1466 = vrsqrt.f32 %v767_v38 }
 0x27a   : > { %v760_v50 = vadd.f32 1e-14, %v718_v34  ;;  %v1734_v51 = vmul.f32 %v1457_v47, %v1642_v33  ;;  %1468 = vrsqrt.f32 %v766_v42 }
 0x27b   : > { %v721_v53 = vpop.xlane.xlu1 %720  ;;  %v1459_v57 = vpop.eup %1458 }
 0x27c   : > { %1470 = vrsqrt.f32 %v760_v50  ;;  %v761_v54 = vadd.f32 1e-14, %v721_v53  ;;  %1376 = vmatprep.subr.msk.mxu0 %vm709_vm0, %v1734_v51  ;;  %1403 = vmatprep.subr.msk.mxu1 %vm709_vm0, %v1734_v51  ;;  %v1752_v37 = vmul.f32 %v1459_v57, %v1646_v36 }
 0x27d   : > { %1472 = vrsqrt.f32 %v759_v48  ;;  %1377 = vmatpush3.xpose.msk.msra.mxu0 %vm709_vm0, %v1734_v51  ;;  %1411 = vmatpush3.xpose.msk.msra.mxu1 %vm709_vm0, %v1734_v51  ;;  %v724_v33 = vpop.xlane.xlu0 %723  ;;  %v1461_v62 = vpop.eup %1460 }
 0x27e   : > { %1474 = vrsqrt.f32 %v761_v54  ;;  %v762_v59 = vadd.f32 1e-14, %v724_v33  ;;  %1378 = vmatprep.subr.msk.mxu0 %vm709_vm0, %v1741_v56  ;;  %1404 = vmatprep.subr.msk.mxu1 %vm709_vm0, %v1741_v56  ;;  %v801_v7 = vmul.f32 %v1461_v62, %v1652_v39 }
 0x27f   : > { %v727_v60 = vpop.xlane.xlu1 %726  ;;  %v1463_v5 = vpop.eup %1462 }
 0x280   : > { %1476 = vrsqrt.f32 %v762_v59  ;;  %v763_v63 = vadd.f32 1e-14, %v727_v60  ;;  %v800_v39 = vmul.f32 %v1463_v5, %v1659_v43 }
 0x281   : > { %1379 = vmatpush3.xpose.msk.msra.mxu0 %vm709_vm0, %v1741_v56  ;;  %1412 = vmatpush3.xpose.msk.msra.mxu1 %vm709_vm0, %v1741_v56  ;;  %v730_v1 = vpop.xlane.xlu0 %729 }
 0x282   : > { %v764_v2 = vadd.f32 1e-14, %v730_v1  ;;  %1380 = vmatprep.subr.msk.mxu0 %vm709_vm0, %v1752_v37  ;;  %1405 = vmatprep.subr.msk.mxu1 %vm709_vm0, %v1752_v37 }
 0x283   : > { %v733_v4 = vpop.xlane.xlu1 %732 }
 0x284   : > { %1478 = vrsqrt.f32 %v764_v2  ;;  %v765_v36 = vadd.f32 1e-14, %v733_v4 }
 0x285   : > { %v1465_v8 = vpop.eup %1464  ;;  %1480 = vrsqrt.f32 %v763_v63  ;;  %1381 = vmatpush3.xpose.msk.msra.mxu0 %vm709_vm0, %v1752_v37  ;;  %1413 = vmatpush3.xpose.msk.msra.mxu1 %vm709_vm0, %v1752_v37 }
 0x286   : > { %1482 = vrsqrt.f32 %v765_v36  ;;  %1382 = vmatprep.subr.msk.mxu0 %vm709_vm0, %v801_v7  ;;  %1406 = vmatprep.subr.msk.mxu1 %vm709_vm0, %v801_v7  ;;  %v790_v10 = vmul.f32 %v1465_v8, %v1674_v52  ;;  %v1467_v11 = vpop.eup %1466 }
 0x287   : > { %v1469_v12 = vpop.eup %1468  ;;  %v799_v52 = vmul.f32 %v1467_v11, %v1664_v46 }
 0x288   : > { %1390 = vmatprep.mubr.msk.f32.mxu0 %vm709_vm0, %v790_v10  ;;  %v798_v43 = vmul.f32 %v1469_v12, %v1669_v49 }
 0x289   : > { %v1471_v13 = vpop.eup %1470  ;;  %1383 = vmatpush3.xpose.msk.msra.mxu0 %vm709_vm0, %v801_v7  ;;  %1414 = vmatpush3.xpose.msk.msra.mxu1 %vm709_vm0, %v801_v7 }
 0x28a   : > { %v1473_v14 = vpop.eup %1472  ;;  %1384 = vmatprep.subr.msk.mxu0 %vm709_vm0, %v800_v39  ;;  %1407 = vmatprep.subr.msk.mxu1 %vm709_vm0, %v800_v39  ;;  %v792_v15 = vmul.f32 %v1471_v13, %v1684_v58  ;;  %v967_v22 = vmul.f32 %v798_v43, %v790_v10 }
 0x28b   : > { %v1475_v16 = vpop.eup %1474  ;;  %v791_v20 = vmul.f32 %v1473_v14, %v1679_v55 }
 0x28c   : > { %v969_v17 = vmul.f32 %v800_v39, %v792_v15  ;;  %v793_v18 = vmul.f32 %v1475_v16, %v1689_v61  ;;  %v975_v24 = vsel %vm709_vm0, %v967_v22, 0.0 }
 0x28d   : > { %v1477_v19 = vpop.eup %1476  ;;  %1385 = vmatpush3.xpose.msk.msra.mxu0 %vm709_vm0, %v800_v39  ;;  %1415 = vmatpush3.xpose.msk.msra.mxu1 %vm709_vm0, %v800_v39  ;;  %v968_v55 = vmul.f32 %v799_v52, %v791_v20 }
 0x28e   : > { %1386 = vmatprep.subr.msk.mxu0 %vm709_vm0, %v799_v52  ;;  %1408 = vmatprep.subr.msk.mxu1 %vm709_vm0, %v799_v52  ;;  %v981_v58 = vsel %vm709_vm0, %v969_v17, 0.0  ;;  %v794_v46 = vmul.f32 %v1477_v19, %v1694_v0  ;;  %v970_v21 = vmul.f32 %v801_v7, %v793_v18 }
 0x28f   : > { %982 = vadd.xlane.f32.xlu0 %v981_v58  ;;  %v978_v29 = vsel %vm709_vm0, %v968_v55, 0.0 }
 0x290   : > { %1396 = vmatprep.mubr.msk.f32.mxu1 %vm709_vm0, %v794_v46  ;;  %v984_v49 = vsel %vm709_vm0, %v970_v21, 0.0  ;;  %v971_v30 = vmul.f32 %v1752_v37, %v794_v46 }
 0x291   : > { %v1479_v61 = vpop.eup %1478  ;;  %1387 = vmatpush3.xpose.msk.msra.mxu0 %vm709_vm0, %v799_v52  ;;  %1416 = vmatpush3.xpose.msk.msra.mxu1 %vm709_vm0, %v799_v52 }
 0x292   : > { %v1481_v23 = vpop.eup %1480  ;;  %985 = vadd.xlane.f32.xlu1 %v984_v49  ;;  %1388 = vmatprep.subr.msk.mxu0 %vm709_vm0, %v798_v43  ;;  %v796_v0 = vmul.f32 %v1479_v61, %v1704_v6 }
 0x293   : > { %v1483_v25 = vpop.eup %1482  ;;  %1409 = vmatprep.subr.msk.mxu1 %vm709_vm0, %v798_v43  ;;  %976 = vadd.xlane.f32.xlu0 %v975_v24  ;;  %v795_v26 = vmul.f32 %v1481_v23, %v1699_v3 }
 0x294   : > { %v797_v27 = vmul.f32 %v1483_v25, %v1709_v9  ;;  %v973_v28 = vmul.f32 %v1734_v51, %v796_v0  ;;  %v987_v9 = vsel %vm709_vm0, %v971_v30, 0.0 }
 0x295   : > { %1389 = vmatpush3.xpose.msk.msra.mxu0 %vm709_vm0, %v798_v43  ;;  %1417 = vmatpush3.xpose.msk.msra.mxu1 %vm709_vm0, %v798_v43  ;;  %v972_v3 = vmul.f32 %v1741_v56, %v795_v26 }
 0x296   : > { %979 = vadd.xlane.f32.xlu1 %v978_v29  ;;  %v974_v6 = vmul.f32 %v1723_v41, %v797_v27  ;;  %v993_v53 = vsel %vm709_vm0, %v973_v28, 0.0 }
 0x297   : > { %v990_v31 = vsel %vm709_vm0, %v972_v3, 0.0 }
 0x298   : > { %1391 = vmatmul.mubr.msk.f32.vlgmr.msra.gmra.mxu0 %vm709_vm0, %v791_v20  ;;  %1397 = vmatmul.mubr.msk.f32.vlgmr.msra.gmra.mxu1 %vm709_vm0, %v795_v26  ;;  %v996_v59 = vsel %vm709_vm0, %v974_v6, 0.0 }
 0x299   : > { %1393 = vmatprep.mubr.msk.f32.mxu0 %vm709_vm0, %v792_v15  ;;  %1399 = vmatprep.mubr.msk.f32.mxu1 %vm709_vm0, %v796_v0 }
 0x29a   : > { %988 = vadd.xlane.f32.xlu1 %v987_v9 }
 0x29c   : > { %1394 = vmatmul.mubr.msk.f32.gmra.mxu0 %vm709_vm0, %v793_v18  ;;  %1400 = vmatmul.mubr.msk.f32.gmra.mxu1 %vm709_vm0, %v797_v27 }
 0x29e   : > { %991 = vadd.xlane.f32.xlu1 %v990_v31 }
 0x318   : > { %v983_v7 = vpop.xlane.xlu0 %982 }
 0x319   : > { %v1853_v55 = vmul.f32 14.285714, %v983_v7 }
 0x31b   : > { %v986_v5 = vpop.xlane.xlu1 %985 }
 0x31c   : > { %v977_v10 = vpop.xlane.xlu0 %976  ;;  %v1845_v58 = vmul.f32 14.285714, %v986_v5 }
 0x31d   : > { %v1833_v13 = vmul.f32 14.285714, %v977_v10 }
 0x31f   : > { %v980_v36 = vpop.xlane.xlu1 %979 }
 0x320   : > { %v1831_v12 = vmul.f32 14.285714, %v980_v36 }
 0x323   : > { %v989_v8 = vpop.xlane.xlu1 %988 }
 0x324   : > { %v1843_v19 = vmul.f32 14.285714, %v989_v8 }
 0x327   : > { %v992_v11 = vpop.xlane.xlu1 %991 }
 0x328   : > { %v1863_v29 = vmul.f32 14.285714, %v992_v11 }
 0x358   : > { %v1392_v32 = vpop.f32.mrf.mxu0  ;;  %v1398_v35 = vpop.f32.mrf.mxu1 }
 0x359   : > { %v960_v38 = vmul.f32 14.285714, %v1392_v32  ;;  %v964_v60 = vmul.f32 14.285714, %v1398_v35 }
 0x35a   : > { %v920_v40 = vpop.f32.mrf.mxu0  ;;  %v940_v41 = vpop.f32.mrf.mxu1 }
 0x35b   : > { %v959_v42 = vmul.f32 14.285714, %v920_v40  ;;  %v1812_v44 = vmul.f32 14.285714, %v940_v41  ;;  %v1011_v45 = vsel %vm1007_vm1, %v960_v38, -inf  ;;  %v1023_v2 = vsel %vm1007_vm1, %v964_v60, -inf }
 0x35c   : > { %1012 = vmax.xlane.f32.xlu0 %v1011_v45  ;;  %v1395_v47 = vpop.f32.mrf.mxu0  ;;  %v1401_v54 = vpop.f32.mrf.mxu1 }
 0x35d   : > { %v1008_v48 = vsel %vm1007_vm1, %v959_v42, -inf  ;;  %v962_v34 = vmul.f32 14.285714, %v1395_v47  ;;  %v1020_v50 = vsel %vm1007_vm1, %v1812_v44, -inf  ;;  %v1820_v33 = vmul.f32 14.285714, %v1401_v54 }
 0x35e   : > { %1009 = vmax.xlane.f32.xlu1 %v1008_v48  ;;  %v930_v51 = vpop.f32.mrf.mxu0  ;;  %v950_v62 = vpop.f32.mrf.mxu1 }
 0x35f   : > { %v961_v56 = vmul.f32 14.285714, %v930_v51  ;;  %v1017_v57 = vsel %vm1007_vm1, %v962_v34, -inf  ;;  %v1029_v63 = vsel %vm1007_vm1, %v1820_v33, -inf  ;;  %v1826_v1 = vmul.f32 14.285714, %v950_v62 }
 0x360   : > { %1021 = vmax.xlane.f32.xlu0 %v1020_v50 }
 0x361   : > { %v1014_v37 = vsel %vm1007_vm1, %v961_v56, -inf  ;;  %v1026_v4 = vsel %vm1007_vm1, %v1826_v1, -inf }
 0x362   : > { %994 = vadd.xlane.f32.xlu1 %v993_v53 }
 0x364   : > { %1018 = vmax.xlane.f32.xlu0 %v1017_v57 }
 0x366   : > { %997 = vadd.xlane.f32.xlu1 %v996_v59 }
 0x368   : > { %1015 = vmax.xlane.f32.xlu0 %v1014_v37 }
 0x36a   : > { %1030 = vmax.xlane.f32.xlu1 %v1029_v63 }
 0x36c   : > { %1024 = vmax.xlane.f32.xlu0 %v1023_v2 }
 0x370   : > { %1027 = vmax.xlane.f32.xlu0 %v1026_v4 }
 0x3e5   : > { %v1013_v39 = vpop.xlane.xlu0 %1012 }
 0x3e6   : > { %v1836_v14 = vmax.f32 %v1013_v39, %v1831_v12 }
 0x3e7   : > { %v1010_v15 = vpop.xlane.xlu1 %1009 }
 0x3e8   : > { %v1041_v16 = vsub.f32 %v960_v38, %v1836_v14  ;;  %v1840_v52 = vmax.f32 %v1010_v15, %v1833_v13 }
 0x3e9   : > { %v1022_v17 = vpop.xlane.xlu0 %1021 }
 0x3ea   : > { %v1050_v18 = vmul.f32 1.442695, %v1041_v16  ;;  %v1040_v43 = vsub.f32 %v959_v42, %v1840_v52  ;;  %v1848_v21 = vmax.f32 %v1022_v17, %v1843_v19 }
 0x3eb   : > { %v995_v20 = vpop.xlane.xlu1 %994 }
 0x3ec   : > { %1484 = vpow2.f32 %v1050_v18  ;;  %v1048_v46 = vmul.f32 1.442695, %v1040_v43  ;;  %v1044_v24 = vsub.f32 %v1812_v44, %v1848_v21  ;;  %v1874_v38 = vmul.f32 14.285714, %v995_v20 }
 0x3ed   : > { %v1019_v22 = vpop.xlane.xlu0 %1018 }
 0x3ee   : > { %1486 = vpow2.f32 %v1048_v46  ;;  %v1851_v49 = vmax.f32 %v1019_v22, %v1845_v58  ;;  %v1056_v9 = vmul.f32 1.442695, %v1044_v24 }
 0x3ef   : > { %v998_v61 = vpop.xlane.xlu1 %997 }
 0x3f0   : > { %v1043_v23 = vsub.f32 %v962_v34, %v1851_v49  ;;  %v1858_v27 = vmul.f32 14.285714, %v998_v61 }
 0x3f1   : > { %v1016_v0 = vpop.xlane.xlu0 %1015 }
 0x3f2   : > { %v1054_v25 = vmul.f32 1.442695, %v1043_v23  ;;  %v1861_v28 = vmax.f32 %v1016_v0, %v1853_v55 }
 0x3f3   : > { %v1031_v26 = vpop.xlane.xlu1 %1030 }
 0x3f4   : > { %1488 = vpow2.f32 %v1054_v25  ;;  %v1042_v30 = vsub.f32 %v961_v56, %v1861_v28  ;;  %v1867_v6 = vmax.f32 %v1031_v26, %v1858_v27 }
 0x3f5   : > { %v1025_v3 = vpop.xlane.xlu0 %1024 }
 0x3f6   : > { %v1052_v31 = vmul.f32 1.442695, %v1042_v30  ;;  %v1047_v32 = vsub.f32 %v1820_v33, %v1867_v6  ;;  %v1872_v35 = vmax.f32 %v1025_v3, %v1863_v29 }
 0x3f8   : > { %1490 = vpow2.f32 %v1052_v31  ;;  %v1045_v40 = vsub.f32 %v964_v60, %v1872_v35  ;;  %v1062_v44 = vmul.f32 1.442695, %v1047_v32 }
 0x3f9   : > { %v1485_v41 = vpop.eup %1484  ;;  %1492 = vpow2.f32 %v1056_v9  ;;  %v1028_v42 = vpop.xlane.xlu0 %1027 }
 0x3fa   : > { %v1058_v45 = vmul.f32 1.442695, %v1045_v40  ;;  %v1878_v47 = vmax.f32 %v1028_v42, %v1874_v38  ;;  %v1067_v48 = vsel %vm1007_vm1, %v1485_v41, 0.0 }
 0x3fb   : > { %v1487_v34 = vpop.eup %1486  ;;  %1068 = vadd.xlane.f32.xlu1 %v1067_v48 }
 0x3fc   : > { %1494 = vpow2.f32 %v1058_v45  ;;  %v1046_v50 = vsub.f32 %v1826_v1, %v1878_v47  ;;  %v1064_v51 = vsel %vm1007_vm1, %v1487_v34, 0.0 }
 0x3fd   : > { %1065 = vadd.xlane.f32.xlu0 %v1064_v51  ;;  %1496 = vpow2.f32 %v1062_v44 }
 0x3fe   : > { %v1060_v53 = vmul.f32 1.442695, %v1046_v50 }
 0x400   : > { %1498 = vpow2.f32 %v1060_v53 }
 0x401   : > { %v1489_v54 = vpop.eup %1488 }
 0x402   : > { %v1073_v56 = vsel %vm1007_vm1, %v1489_v54, 0.0 }
 0x403   : > { %1074 = vadd.xlane.f32.xlu1 %v1073_v56 }
 0x405   : > { %v1491_v57 = vpop.eup %1490 }
 0x406   : > { %v1493_v33 = vpop.eup %1492  ;;  %v1070_v59 = vsel %vm1007_vm1, %v1491_v57, 0.0 }
 0x407   : > { %1071 = vadd.xlane.f32.xlu0 %v1070_v59  ;;  %v1076_v37 = vsel %vm1007_vm1, %v1493_v33, 0.0 }
 0x409   : > { %v1495_v60 = vpop.eup %1494 }
 0x40a   : > { %v1079_v62 = vsel %vm1007_vm1, %v1495_v60, 0.0  ;;  %v1497_v63 = vpop.eup %1496 }
 0x40b   : > { %1077 = vadd.xlane.f32.xlu0 %v1076_v37  ;;  %1080 = vadd.xlane.f32.xlu1 %v1079_v62  ;;  %v1085_v2 = vsel %vm1007_vm1, %v1497_v63, 0.0 }
 0x40d   : > { %v1499_v1 = vpop.eup %1498 }
 0x40e   : > { %v1082_v4 = vsel %vm1007_vm1, %v1499_v1, 0.0 }
 0x40f   : > { %1086 = vadd.xlane.f32.xlu1 %v1085_v2  ;;  %1083 = vadd.xlane.f32.xlu0 %v1082_v4 }
 0x484   : > { %v1069_v5 = vpop.xlane.xlu1 %1068 }
 0x485   : > { %1500 = vlog2.f32 %v1069_v5 }
 0x486   : > { %v1066_v36 = vpop.xlane.xlu0 %1065 }
 0x487   : > { %1502 = vlog2.f32 %v1066_v36 }
 0x48c   : > { %v1075_v7 = vpop.xlane.xlu1 %1074 }
 0x48d   : > { %1504 = vlog2.f32 %v1075_v7 }
 0x490   : > { %v1072_v8 = vpop.xlane.xlu0 %1071 }
 0x491   : > { %1506 = vlog2.f32 %v1072_v8 }
 0x492   : > { %v1501_v10 = vpop.eup %1500 }
 0x493   : > { %v1091_v17 = vmul.f32 0.6931472, %v1501_v10 }
 0x494   : > { %v1503_v11 = vpop.eup %1502  ;;  %v1081_v39 = vpop.xlane.xlu1 %1080 }
 0x495   : > { %v1078_v15 = vpop.xlane.xlu0 %1077  ;;  %v1089_v16 = vmul.f32 0.6931472, %v1503_v11  ;;  %1508 = vlog2.f32 %v1081_v39  ;;  %v1105_v22 = vadd.f32 %v1091_v17, %v1836_v14 }
 0x496   : > { %1510 = vlog2.f32 %v1078_v15 }
 0x497   : > { %v1104_v20 = vadd.f32 %v1089_v16, %v1840_v52  ;;  %v1113_v0 = vsub.f32 %v1105_v22, %v1831_v12 }
 0x498   : > { %v1087_v18 = vpop.xlane.xlu1 %1086 }
 0x499   : > { %v1084_v43 = vpop.xlane.xlu0 %1083  ;;  %1512 = vlog2.f32 %v1087_v18  ;;  %v1112_v23 = vsub.f32 %v1104_v20, %v1833_v13  ;;  %v1122_v31 = vsel %vm1120_vm2, %v1113_v0, 0.0 }
 0x49a   : > { %v1505_v46 = vpop.eup %1504  ;;  %1514 = vlog2.f32 %v1084_v43 }
 0x49b   : > { %v1095_v61 = vmul.f32 0.6931472, %v1505_v46  ;;  %v1121_v30 = vsel %vm1120_vm2, %v1112_v23, 0.0 }
 0x49c   : > { %v1123_v40 = vadd.f32 %v1122_v31, %v1121_v30 }
 0x49d   : > { %v1107_v25 = vadd.f32 %v1095_v61, %v1851_v49 }
 0x49e   : > { %v1507_v24 = vpop.eup %1506 }
 0x49f   : > { %v1093_v26 = vmul.f32 0.6931472, %v1507_v24  ;;  %v1115_v14 = vsub.f32 %v1107_v25, %v1845_v58 }
 0x4a1   : > { %v1106_v9 = vadd.f32 %v1093_v26, %v1861_v28  ;;  %v1126_v48 = vsel %vm1120_vm2, %v1115_v14, 0.0 }
 0x4a2   : > { %v1509_v52 = vpop.eup %1508 }
 0x4a3   : > { %v1511_v3 = vpop.eup %1510  ;;  %v1114_v32 = vsub.f32 %v1106_v9, %v1853_v55  ;;  %v1099_v13 = vmul.f32 0.6931472, %v1509_v52 }
 0x4a4   : > { %v1097_v41 = vmul.f32 0.6931472, %v1511_v3 }
 0x4a5   : > { %v1124_v12 = vsel %vm1120_vm2, %v1114_v32, 0.0  ;;  %v1109_v49 = vadd.f32 %v1099_v13, %v1872_v35 }
 0x4a6   : > { %v1513_v42 = vpop.eup %1512  ;;  %v1125_v44 = vadd.f32 %v1124_v12, %v1123_v40  ;;  %v1108_v45 = vadd.f32 %v1097_v41, %v1848_v21 }
 0x4a7   : > { %v1515_v28 = vpop.eup %1514  ;;  %v1103_v34 = vmul.f32 0.6931472, %v1513_v42  ;;  %v1117_v50 = vsub.f32 %v1109_v49, %v1863_v29 }
 0x4a8   : > { %v1116_v58 = vsub.f32 %v1108_v45, %v1843_v19  ;;  %v1101_v55 = vmul.f32 0.6931472, %v1515_v28  ;;  %v1127_v51 = vadd.f32 %v1126_v48, %v1125_v44 }
 0x4a9   : > { %v1111_v53 = vadd.f32 %v1103_v34, %v1867_v6  ;;  %v1130_v33 = vsel %vm1120_vm2, %v1117_v50, 0.0 }
 0x4aa   : > { %v1110_v54 = vadd.f32 %v1101_v55, %v1878_v47  ;;  %v1128_v35 = vsel %vm1120_vm2, %v1116_v58, 0.0 }
 0x4ab   : > { %v1129_v56 = vadd.f32 %v1128_v35, %v1127_v51  ;;  %v1119_v21 = vsub.f32 %v1111_v53, %v1858_v27 }
 0x4ac   : > { %v1118_v57 = vsub.f32 %v1110_v54, %v1874_v38 }
 0x4ad   : > { %v1131_v59 = vadd.f32 %v1130_v33, %v1129_v56  ;;  %v1134_v60 = vsel %vm1120_vm2, %v1119_v21, 0.0 }
 0x4ae   : > { %v1132_v29 = vsel %vm1120_vm2, %v1118_v57, 0.0 }
 0x4af   : > { %v1133_v19 = vadd.f32 %v1132_v29, %v1131_v59 }
 0x4b1   : > { %v1135_v37 = vadd.f32 %v1134_v60, %v1133_v19 }
 0x4b3   : > { %1136 = vadd.xlane.f32.xlu0 %v1135_v37 }
 0x53c   : > { %v1137_v6 = vpop.xlane.xlu0 %1136 }
 0x53d   : > { %v1138_v47 = vrot.slane %v1137_v6, 4 }
 0x53f   : > { %v1139_v62 = vadd.f32 %v1138_v47, %v1137_v6 }
 0x541   : > { %v1140_v63 = vrot.slane %v1139_v62, 2 }
 0x543   : > { %v1141_v1 = vadd.f32 %v1140_v63, %v1139_v62 }
 0x545   : > { %v1142_v2 = vrot.slane %v1141_v1, 1 }
 0x547   : > { %v1143_v38 = vadd.f32 %v1142_v2, %v1141_v1 }
 0x549   : > { %1418 = vpush %v1143_v38 }
 0x57a   : > { %s1419_s25 = spop %1418 }
 0x57b   : > { %v1145_v27 = vstv %s1419_s25 }
 0x57c   : > { %1147 = vst.msk [vmem:[%s267_s24] sm:$0x1] %vm1146_vm3, %v1145_v27 }
 0x57d PF: > { %s16_s21 = sadd.s32 1, %s1522_s21  }
 0x57e   : > { %p13_p4 = scmp.ge.s32.totalorder %s16_s21, 4  }
 0x580   :  { %15 = sbr.rel (!%p13_p4) target bundleno = 1 (0x1), region = 77 }

// kernel: ccpl_forward.2
= control target key start
LH: loop header
LB: loop body
LE: loop exit
PB: predicated region body
PF: predicated region fallthrough
CT: control target
= control target key end

     0   :  { %s1511_s21 = smov 0   ;;  %s1853_s0 = inlined_call_operand.vmem [shape: bf16[2,64,64], index: 0, kind: input, shape index: {}]   ;;  %s1854_s1 = inlined_call_operand.vmem [shape: bf16[2,64,64], index: 1, kind: input, shape index: {}]   ;;  %s1855_s2 = inlined_call_operand.vmem [shape: bf16[64,64], index: 2, kind: input, shape index: {}]   ;;  %s1856_s3 = inlined_call_operand.vmem [shape: f32[1,64], index: 3, kind: input, shape index: {}]   ;;  %s1857_s4 = inlined_call_operand.vmem [shape: bf16[64,16], index: 4, kind: input, shape index: {}]   ;;  %s1858_s5 = inlined_call_operand.vmem [shape: f32[1,16], index: 5, kind: input, shape index: {}]   ;;  %s1859_s6 = inlined_call_operand.vmem [shape: f32[2,1,1], index: 6, kind: output, shape index: {}]  }
   0x1 LB: > { %s1183_s22 = sadd.s32 4294967295, %s1474_s21   ;;  %p1187_p0 = scmp.ge.s32.totalorder %s1474_s21, 1  ;;  %s1474_s21 = sphi %s1511_s21, %s16_s21  }
   0x2   : > { %p222_p1 = scmp.lt.s32.totalorder %s1474_s21, 3 }
   0x4   : > { %p223_p2 = pnand %p1187_p0, %p222_p1 }
   0x5   : > { %p255_p3 = scmp.lt.s32.totalorder (!%p223_p2), %s1183_s22, 1 }
   0x6   : > { %226 = sbr.rel (%p223_p2) target bundleno = 1389 (0x56d), region = 44 }
   0xb   : > { %v1388_v0 = vld [vmem:[%s1855_s2 + $0x18] sm:$0xff]   ;;  %v1389_v1 = vld [vmem:[%s1855_s2 + $0x10] sm:$0xff]   ;;  %s1861_s22 = smov (!%p255_p3, %s1183_s22), 1  ;;  %v1390_v2 = vld [vmem:[%s1855_s2 + $0x8] sm:$0xff]   ;;  %vm364_vm0 = vcmask 523264   ;;  %vm686_vm1 = vcmask 130048  }
   0xc   : > { %1286 = vmatprep.subr.bf16.mxu0 %v1388_v0  ;;  %s1244_s29 = sshll.u32 %s1861_s22, 5  ;;  %v1400_v3 = vld [vmem:[%s1857_s4 + $0x18] sm:$0xff]   ;;  %v1391_v5 = vld [vmem:[%s1855_s2] sm:$0xff]   ;;  %v1401_v13 = vld [vmem:[%s1857_s4 + $0x10] sm:$0xff]   ;;  %vm1096_vm2 = vcmask 7168   ;;  %s267_s30 = scalar_lea.vmem %s1859_s6, %s1861_s22  ;;  %vm1122_vm3 = vcmask 0  }
   0xd   : > { %1287 = vmatpush3.bf16.msra.mxu0 %v1388_v0  ;;  %s259_s10 = scalar_lea.vmem %s1853_s0, %s1244_s29  ;;  %1310 = vmatprep.subr.bf16.mxu1 %v1400_v3  ;;  %s264_s15 = scalar_lea.vmem %s1854_s1, %s1244_s29  ;;  %v1402_v14 = vld [vmem:[%s1857_s4 + $0x8] sm:$0xff]   ;;  %v1403_v15 = vld [vmem:[%s1857_s4] sm:$0xff]  }
   0xe   : > { %1288 = vmatprep.subr.bf16.mxu0 %v1389_v1  ;;  %v1392_v4 = vld [vmem:[%s259_s10] sm:$0xff]   ;;  %1311 = vmatpush3.bf16.msra.mxu1 %v1400_v3  ;;  %v1393_v6 = vld [vmem:[%s259_s10 + $0x8] sm:$0xff]   ;;  %v1394_v7 = vld [vmem:[%s259_s10 + $0x10] sm:$0xff]  }
   0xf   : > { %1294 = vmatprep.mubr.msk.bf16.mxu0 %vm364_vm0, %v1392_v4  ;;  %v1395_v8 = vld [vmem:[%s259_s10 + $0x18] sm:$0xff]   ;;  %v1396_v9 = vld [vmem:[%s264_s15] sm:$0xff]   ;;  %v1397_v10 = vld [vmem:[%s264_s15 + $0x8] sm:$0xff]   ;;  %1312 = vmatprep.subr.bf16.mxu1 %v1401_v13 }
  0x10   : > { %v1398_v11 = vld [vmem:[%s264_s15 + $0x10] sm:$0xff]   ;;  %v1399_v12 = vld [vmem:[%s264_s15 + $0x18] sm:$0xff]   ;;  %v1200_v18 = vld [vmem:[%s1856_s3] ss:$0 sm:$0xff] }
  0x11   : > { %1289 = vmatpush3.bf16.msra.mxu0 %v1389_v1 }
  0x12   : > { %1290 = vmatprep.subr.bf16.mxu0 %v1390_v2  ;;  %1313 = vmatpush3.bf16.msra.mxu1 %v1401_v13 }
  0x13   : > { %1314 = vmatprep.subr.bf16.mxu1 %v1402_v14 }
  0x15   : > { %1291 = vmatpush3.bf16.msra.mxu0 %v1390_v2 }
  0x16   : > { %1292 = vmatprep.subr.bf16.mxu0 %v1391_v5  ;;  %1315 = vmatpush3.bf16.msra.mxu1 %v1402_v14 }
  0x17   : > { %1316 = vmatprep.subr.bf16.mxu1 %v1403_v15 }
  0x19   : > { %1293 = vmatpush3.bf16.msra.mxu0 %v1391_v5 }
  0x1a   : > { %1317 = vmatpush3.bf16.msra.mxu1 %v1403_v15 }
  0x1c   : > { %1295 = vmatmul.mubr.msk.bf16.vlgmr.msra.gmra.mxu0 %vm364_vm0, %v1393_v6 }
  0x1d   : > { %1298 = vmatprep.mubr.msk.bf16.mxu0 %vm364_vm0, %v1394_v7 }
  0x24   : > { %1299 = vmatmul.mubr.msk.bf16.gmra.mxu0 %vm364_vm0, %v1395_v8 }
  0x25   : > { %1302 = vmatprep.mubr.msk.bf16.mxu0 %vm364_vm0, %v1396_v9 }
  0x2c   : > { %1303 = vmatmul.mubr.msk.bf16.gmra.mxu0 %vm364_vm0, %v1397_v10 }
  0x2d   : > { %1306 = vmatprep.mubr.msk.bf16.mxu0 %vm364_vm0, %v1398_v11 }
  0x34   : > { %1307 = vmatmul.mubr.msk.bf16.gmra.mxu0 %vm364_vm0, %v1399_v12 }
  0xdc   : > { %v1296_v16 = vpop.f32.mrf.mxu0 }
  0xdd   : > { %v432_v22 = vadd.f32 %v1296_v16, %v1200_v18 }
  0xde   : > { %v423_v17 = vpop.f32.mrf.mxu0 }
  0xdf   : > { %v424_v20 = vadd.f32 %v1200_v18, %v423_v17  ;;  %v488_v29 = vmax.f32 %v432_v22, 0.0 }
  0xe0   : > { %v1297_v19 = vpop.f32.mrf.mxu0 }
  0xe1   : > { %v435_v21 = vadd.f32 %v1297_v19, %v1200_v18  ;;  %v486_v27 = vmax.f32 %v424_v20, 0.0 }
  0xe2   : > { %v426_v23 = vpop.f32.mrf.mxu0 }
  0xe3   : > { %v427_v24 = vadd.f32 %v1200_v18, %v426_v23  ;;  %v489_v25 = vmax.f32 %v435_v21, 0.0  ;;  %v1213_v23 = vld [vmem:[%s1858_s5] ss:$0 sm:$0xff] }
  0xe4   : > { %v1300_v26 = vpop.f32.mrf.mxu0 }
  0xe5   : > { %v487_v28 = vmax.f32 %v427_v24, 0.0  ;;  %v503_v32 = vpack.c.bf16 %v489_v25, %v488_v29  ;;  %v448_v36 = vadd.f32 %v1300_v26, %v1200_v18 }
  0xe6   : > { %v439_v30 = vpop.f32.mrf.mxu0 }
  0xe7   : > { %v502_v31 = vpack.c.bf16 %v487_v28, %v486_v27  ;;  %v440_v34 = vadd.f32 %v1200_v18, %v439_v30  ;;  %v492_v43 = vmax.f32 %v448_v36, 0.0 }
  0xe8   : > { %v1301_v33 = vpop.f32.mrf.mxu0 }
  0xe9   : > { %v451_v35 = vadd.f32 %v1301_v33, %v1200_v18  ;;  %1318 = vmatprep.mubr.msk.bf16.mxu1 %vm364_vm0, %v502_v31  ;;  %v490_v41 = vmax.f32 %v440_v34, 0.0 }
  0xea   : > { %v442_v37 = vpop.f32.mrf.mxu0  ;;  %1319 = vmatmul.mubr.msk.bf16.vlgmr.msra.gmra.mxu1 %vm364_vm0, %v503_v32 }
  0xeb   : > { %v443_v38 = vadd.f32 %v1200_v18, %v442_v37  ;;  %v493_v39 = vmax.f32 %v451_v35, 0.0 }
  0xec   : > { %v1304_v40 = vpop.f32.mrf.mxu0 }
  0xed   : > { %v491_v42 = vmax.f32 %v443_v38, 0.0  ;;  %v505_v46 = vpack.c.bf16 %v493_v39, %v492_v43  ;;  %v464_v50 = vadd.f32 %v1304_v40, %v1200_v18 }
  0xee   : > { %v455_v44 = vpop.f32.mrf.mxu0 }
  0xef   : > { %v504_v45 = vpack.c.bf16 %v491_v42, %v490_v41  ;;  %v456_v48 = vadd.f32 %v1200_v18, %v455_v44  ;;  %v496_v57 = vmax.f32 %v464_v50, 0.0 }
  0xf0   : > { %v1305_v47 = vpop.f32.mrf.mxu0 }
  0xf1   : > { %v467_v49 = vadd.f32 %v1305_v47, %v1200_v18  ;;  %1322 = vmatprep.mubr.msk.bf16.mxu1 %vm364_vm0, %v504_v45  ;;  %v494_v55 = vmax.f32 %v456_v48, 0.0 }
  0xf2   : > { %v458_v51 = vpop.f32.mrf.mxu0  ;;  %1323 = vmatmul.mubr.msk.bf16.gmra.mxu1 %vm364_vm0, %v505_v46 }
  0xf3   : > { %v459_v52 = vadd.f32 %v1200_v18, %v458_v51  ;;  %v497_v53 = vmax.f32 %v467_v49, 0.0 }
  0xf4   : > { %v1308_v54 = vpop.f32.mrf.mxu0 }
  0xf5   : > { %v495_v56 = vmax.f32 %v459_v52, 0.0  ;;  %v507_v60 = vpack.c.bf16 %v497_v53, %v496_v57  ;;  %v480_v0 = vadd.f32 %v1308_v54, %v1200_v18 }
  0xf6   : > { %v471_v58 = vpop.f32.mrf.mxu0 }
  0xf7   : > { %v506_v59 = vpack.c.bf16 %v495_v56, %v494_v55  ;;  %v472_v62 = vadd.f32 %v1200_v18, %v471_v58  ;;  %v500_v6 = vmax.f32 %v480_v0, 0.0 }
  0xf8   : > { %v1309_v61 = vpop.f32.mrf.mxu0 }
  0xf9   : > { %v483_v63 = vadd.f32 %v1309_v61, %v1200_v18  ;;  %1326 = vmatprep.mubr.msk.bf16.mxu1 %vm364_vm0, %v506_v59  ;;  %v498_v4 = vmax.f32 %v472_v62, 0.0 }
  0xfa   : > { %v474_v1 = vpop.f32.mrf.mxu0  ;;  %1327 = vmatmul.mubr.msk.bf16.gmra.mxu1 %vm364_vm0, %v507_v60 }
  0xfb   : > { %v475_v2 = vadd.f32 %v1200_v18, %v474_v1  ;;  %v501_v3 = vmax.f32 %v483_v63, 0.0 }
  0xfd   : > { %v499_v5 = vmax.f32 %v475_v2, 0.0  ;;  %v509_v8 = vpack.c.bf16 %v501_v3, %v500_v6 }
  0xff   : > { %v508_v7 = vpack.c.bf16 %v499_v5, %v498_v4 }
 0x101   : > { %1330 = vmatprep.mubr.msk.bf16.mxu1 %vm364_vm0, %v508_v7 }
 0x102   : > { %1331 = vmatmul.mubr.msk.bf16.gmra.mxu1 %vm364_vm0, %v509_v8 }
 0x1aa   : > { %v1320_v9 = vpop.f32.mrf.mxu1 }
 0x1ab   : > { %v1616_v50 = vadd.f32 %v1320_v9, %v1213_v23 }
 0x1ac   : > { %v607_v10 = vpop.f32.mrf.mxu1 }
 0x1ad   : > { %v1606_v44 = vadd.f32 %v1213_v23, %v607_v10  ;;  %v672_v58 = vmul.f32 %v1616_v50, %v1616_v50 }
 0x1ae   : > { %v1321_v11 = vpop.f32.mrf.mxu1 }
 0x1af   : > { %v670_v52 = vmul.f32 %v1606_v44, %v1606_v44  ;;  %v1621_v53 = vadd.f32 %v1321_v11, %v1213_v23  ;;  %v693_v63 = vsel %vm686_vm1, %v672_v58, 0.0 }
 0x1b0   : > { %v610_v12 = vpop.f32.mrf.mxu1 }
 0x1b1   : > { %v1611_v47 = vadd.f32 %v1213_v23, %v610_v12  ;;  %v687_v57 = vsel %vm686_vm1, %v670_v52, 0.0  ;;  %v673_v61 = vmul.f32 %v1621_v53, %v1621_v53 }
 0x1b2   : > { %v1324_v13 = vpop.f32.mrf.mxu1 }
 0x1b3   : > { %v671_v55 = vmul.f32 %v1611_v47, %v1611_v47  ;;  %v1636_v62 = vadd.f32 %v1324_v13, %v1213_v23  ;;  %v696_v2 = vsel %vm686_vm1, %v673_v61, 0.0 }
 0x1b4   : > { %v623_v14 = vpop.f32.mrf.mxu1 }
 0x1b5   : > { %v1626_v56 = vadd.f32 %v1213_v23, %v623_v14  ;;  %v690_v60 = vsel %vm686_vm1, %v671_v55, 0.0  ;;  %v676_v5 = vmul.f32 %v1636_v62, %v1636_v62 }
 0x1b6   : > { %v1325_v15 = vpop.f32.mrf.mxu1 }
 0x1b7   : > { %v674_v0 = vmul.f32 %v1626_v56, %v1626_v56  ;;  %v1641_v1 = vadd.f32 %v1325_v15, %v1213_v23  ;;  %v705_v8 = vsel %vm686_vm1, %v676_v5, 0.0 }
 0x1b8   : > { %v626_v16 = vpop.f32.mrf.mxu1 }
 0x1b9   : > { %v1631_v59 = vadd.f32 %v1213_v23, %v626_v16  ;;  %v699_v4 = vsel %vm686_vm1, %v674_v0, 0.0  ;;  %v677_v7 = vmul.f32 %v1641_v1, %v1641_v1 }
 0x1ba   : > { %v1328_v17 = vpop.f32.mrf.mxu1 }
 0x1bb   : > { %v1591_v35 = vadd.f32 %v1328_v17, %v1213_v23  ;;  %v675_v3 = vmul.f32 %v1631_v59, %v1631_v59  ;;  %v708_v9 = vsel %vm686_vm1, %v677_v7, 0.0 }
 0x1bc   : > { %v639_v18 = vpop.f32.mrf.mxu1 }
 0x1bd   : > { %v1601_v41 = vadd.f32 %v1213_v23, %v639_v18  ;;  %v680_v43 = vmul.f32 %v1591_v35, %v1591_v35  ;;  %v702_v6 = vsel %vm686_vm1, %v675_v3, 0.0 }
 0x1be   : > { %v1329_v19 = vpop.f32.mrf.mxu1 }
 0x1bf   : > { %v1584_v31 = vadd.f32 %v1329_v19, %v1213_v23  ;;  %v717_v48 = vsel %vm686_vm1, %v680_v43, 0.0  ;;  %v678_v49 = vmul.f32 %v1601_v41, %v1601_v41 }
 0x1c0   : > { %v642_v20 = vpop.f32.mrf.mxu1 }
 0x1c1   : > { %v1596_v38 = vadd.f32 %v1213_v23, %v642_v20  ;;  %v681_v40 = vmul.f32 %v1584_v31, %v1584_v31  ;;  %v711_v54 = vsel %vm686_vm1, %v678_v49, 0.0 }
 0x1c2   : > { %v1332_v21 = vpop.f32.mrf.mxu1 }
 0x1c3   : > { %v1574_v25 = vadd.f32 %v1332_v21, %v1213_v23  ;;  %v720_v45 = vsel %vm686_vm1, %v681_v40, 0.0  ;;  %v679_v46 = vmul.f32 %v1596_v38, %v1596_v38 }
 0x1c4   : > { %v655_v22 = vpop.f32.mrf.mxu1 }
 0x1c5   : > { %v1578_v28 = vadd.f32 %v1213_v23, %v655_v22  ;;  %v684_v34 = vmul.f32 %v1574_v25, %v1574_v25  ;;  %v714_v51 = vsel %vm686_vm1, %v679_v46, 0.0 }
 0x1c6   : > { %v1333_v24 = vpop.f32.mrf.mxu1 }
 0x1c7   : > { %v1576_v26 = vadd.f32 %v1333_v24, %v1213_v23  ;;  %v682_v37 = vmul.f32 %v1578_v28, %v1578_v28  ;;  %v729_v39 = vsel %vm686_vm1, %v684_v34, 0.0 }
 0x1c8   : > { %v658_v27 = vpop.f32.mrf.mxu1 }
 0x1c9   : > { %v1580_v29 = vadd.f32 %v1213_v23, %v658_v27  ;;  %v685_v30 = vmul.f32 %v1576_v26, %v1576_v26  ;;  %v723_v42 = vsel %vm686_vm1, %v682_v37, 0.0 }
 0x1cb   : > { %v732_v32 = vsel %vm686_vm1, %v685_v30, 0.0  ;;  %v683_v33 = vmul.f32 %v1580_v29, %v1580_v29 }
 0x1cc   : > { %733 = vadd.xlane.f32.xlu0 %v732_v32 }
 0x1cd   : > { %v726_v36 = vsel %vm686_vm1, %v683_v33, 0.0 }
 0x1ce   : > { %727 = vadd.xlane.f32.xlu1 %v726_v36 }
 0x1d0   : > { %730 = vadd.xlane.f32.xlu0 %v729_v39 }
 0x1d2   : > { %724 = vadd.xlane.f32.xlu1 %v723_v42 }
 0x1d4   : > { %721 = vadd.xlane.f32.xlu0 %v720_v45 }
 0x1d6   : > { %718 = vadd.xlane.f32.xlu1 %v717_v48 }
 0x1d8   : > { %715 = vadd.xlane.f32.xlu0 %v714_v51 }
 0x1da   : > { %712 = vadd.xlane.f32.xlu1 %v711_v54 }
 0x1dc   : > { %688 = vadd.xlane.f32.xlu0 %v687_v57 }
 0x1de   : > { %691 = vadd.xlane.f32.xlu1 %v690_v60 }
 0x1e0   : > { %694 = vadd.xlane.f32.xlu0 %v693_v63 }
 0x1e2   : > { %697 = vadd.xlane.f32.xlu1 %v696_v2 }
 0x1e4   : > { %700 = vadd.xlane.f32.xlu0 %v699_v4 }
 0x1e6   : > { %703 = vadd.xlane.f32.xlu1 %v702_v6 }
 0x1e8   : > { %706 = vadd.xlane.f32.xlu0 %v705_v8 }
 0x1ea   : > { %709 = vadd.xlane.f32.xlu1 %v708_v9 }
 0x255   : > { %v734_v10 = vpop.xlane.xlu0 %733 }
 0x256   : > { %v750_v11 = vadd.f32 1e-14, %v734_v10 }
 0x257   : > { %v728_v12 = vpop.xlane.xlu1 %727 }
 0x258   : > { %1404 = vrsqrt.f32 %v750_v11  ;;  %v748_v13 = vadd.f32 1e-14, %v728_v12 }
 0x259   : > { %v731_v14 = vpop.xlane.xlu0 %730 }
 0x25a   : > { %v749_v15 = vadd.f32 1e-14, %v731_v14  ;;  %1406 = vrsqrt.f32 %v748_v13 }
 0x25b   : > { %v725_v16 = vpop.xlane.xlu1 %724 }
 0x25c   : > { %1408 = vrsqrt.f32 %v749_v15  ;;  %v747_v17 = vadd.f32 1e-14, %v725_v16 }
 0x25d   : > { %v722_v18 = vpop.xlane.xlu0 %721 }
 0x25e   : > { %1410 = vrsqrt.f32 %v747_v17  ;;  %v746_v20 = vadd.f32 1e-14, %v722_v18 }
 0x25f   : > { %v719_v19 = vpop.xlane.xlu1 %718 }
 0x260   : > { %v745_v22 = vadd.f32 1e-14, %v719_v19  ;;  %1412 = vrsqrt.f32 %v746_v20 }
 0x261   : > { %v716_v21 = vpop.xlane.xlu0 %715 }
 0x262   : > { %v744_v30 = vadd.f32 1e-14, %v716_v21  ;;  %1414 = vrsqrt.f32 %v745_v22 }
 0x263   : > { %v713_v23 = vpop.xlane.xlu1 %712 }
 0x264   : > { %v743_v34 = vadd.f32 1e-14, %v713_v23 }
 0x265   : > { %v1405_v24 = vpop.eup %1404  ;;  %v689_v27 = vpop.xlane.xlu0 %688 }
 0x266   : > { %v735_v32 = vadd.f32 1e-14, %v689_v27  ;;  %v1655_v33 = vmul.f32 %v1405_v24, %v1576_v26 }
 0x267   : > { %v692_v36 = vpop.xlane.xlu1 %691  ;;  %v1407_v37 = vpop.eup %1406 }
 0x268   : > { %1416 = vrsqrt.f32 %v735_v32  ;;  %1334 = vmatprep.subr.msk.mxu0 %vm686_vm1, %v1655_v33  ;;  %1362 = vmatprep.subr.msk.mxu1 %vm686_vm1, %v1655_v33  ;;  %v736_v40 = vadd.f32 1e-14, %v692_v36  ;;  %v1673_v48 = vmul.f32 %v1407_v37, %v1580_v29 }
 0x269   : > { %v1409_v39 = vpop.eup %1408  ;;  %1335 = vmatpush3.xpose.msk.msra.mxu0 %vm686_vm1, %v1655_v33  ;;  %1370 = vmatpush3.xpose.msk.msra.mxu1 %vm686_vm1, %v1655_v33  ;;  %v695_v26 = vpop.xlane.xlu0 %694  ;;  %1418 = vrsqrt.f32 %v744_v30 }
 0x26a   : > { %v737_v42 = vadd.f32 1e-14, %v695_v26  ;;  %v1666_v43 = vmul.f32 %v1409_v39, %v1574_v25  ;;  %1420 = vrsqrt.f32 %v743_v34 }
 0x26b   : > { %v698_v45 = vpop.xlane.xlu1 %697  ;;  %v1411_v49 = vpop.eup %1410 }
 0x26c   : > { %1422 = vrsqrt.f32 %v737_v42  ;;  %v738_v46 = vadd.f32 1e-14, %v698_v45  ;;  %1336 = vmatprep.subr.msk.mxu0 %vm686_vm1, %v1666_v43  ;;  %1363 = vmatprep.subr.msk.mxu1 %vm686_vm1, %v1666_v43  ;;  %v1684_v29 = vmul.f32 %v1411_v49, %v1578_v28 }
 0x26d   : > { %1424 = vrsqrt.f32 %v736_v40  ;;  %1337 = vmatpush3.xpose.msk.msra.mxu0 %vm686_vm1, %v1666_v43  ;;  %1371 = vmatpush3.xpose.msk.msra.mxu1 %vm686_vm1, %v1666_v43  ;;  %v701_v25 = vpop.xlane.xlu0 %700  ;;  %v1413_v54 = vpop.eup %1412 }
 0x26e   : > { %1426 = vrsqrt.f32 %v738_v46  ;;  %v739_v51 = vadd.f32 1e-14, %v701_v25  ;;  %1338 = vmatprep.subr.msk.mxu0 %vm686_vm1, %v1673_v48  ;;  %1364 = vmatprep.subr.msk.mxu1 %vm686_vm1, %v1673_v48  ;;  %v778_v63 = vmul.f32 %v1413_v54, %v1584_v31 }
 0x26f   : > { %v704_v52 = vpop.xlane.xlu1 %703  ;;  %v1415_v61 = vpop.eup %1414 }
 0x270   : > { %1428 = vrsqrt.f32 %v739_v51  ;;  %v740_v55 = vadd.f32 1e-14, %v704_v52  ;;  %v777_v31 = vmul.f32 %v1415_v61, %v1591_v35 }
 0x271   : > { %1339 = vmatpush3.xpose.msk.msra.mxu0 %vm686_vm1, %v1673_v48  ;;  %1372 = vmatpush3.xpose.msk.msra.mxu1 %vm686_vm1, %v1673_v48  ;;  %v707_v57 = vpop.xlane.xlu0 %706 }
 0x272   : > { %v741_v58 = vadd.f32 1e-14, %v707_v57  ;;  %1340 = vmatprep.subr.msk.mxu0 %vm686_vm1, %v1684_v29  ;;  %1365 = vmatprep.subr.msk.mxu1 %vm686_vm1, %v1684_v29 }
 0x273   : > { %v710_v60 = vpop.xlane.xlu1 %709 }
 0x274   : > { %1430 = vrsqrt.f32 %v741_v58  ;;  %v742_v28 = vadd.f32 1e-14, %v710_v60 }
 0x275   : > { %v1417_v0 = vpop.eup %1416  ;;  %1432 = vrsqrt.f32 %v740_v55  ;;  %1341 = vmatpush3.xpose.msk.msra.mxu0 %vm686_vm1, %v1684_v29  ;;  %1373 = vmatpush3.xpose.msk.msra.mxu1 %vm686_vm1, %v1684_v29 }
 0x276   : > { %1434 = vrsqrt.f32 %v742_v28  ;;  %1342 = vmatprep.subr.msk.mxu0 %vm686_vm1, %v778_v63  ;;  %1366 = vmatprep.subr.msk.mxu1 %vm686_vm1, %v778_v63  ;;  %v767_v2 = vmul.f32 %v1417_v0, %v1606_v44  ;;  %v1419_v3 = vpop.eup %1418 }
 0x277   : > { %v1421_v4 = vpop.eup %1420  ;;  %v776_v44 = vmul.f32 %v1419_v3, %v1596_v38 }
 0x278   : > { %1350 = vmatprep.mubr.msk.f32.mxu0 %vm686_vm1, %v767_v2  ;;  %v775_v35 = vmul.f32 %v1421_v4, %v1601_v41 }
 0x279   : > { %v1423_v5 = vpop.eup %1422  ;;  %1343 = vmatpush3.xpose.msk.msra.mxu0 %vm686_vm1, %v778_v63  ;;  %1374 = vmatpush3.xpose.msk.msra.mxu1 %vm686_vm1, %v778_v63 }
 0x27a   : > { %v1425_v6 = vpop.eup %1424  ;;  %1344 = vmatprep.subr.msk.mxu0 %vm686_vm1, %v777_v31  ;;  %1367 = vmatprep.subr.msk.mxu1 %vm686_vm1, %v777_v31  ;;  %v769_v7 = vmul.f32 %v1423_v5, %v1616_v50  ;;  %v944_v14 = vmul.f32 %v775_v35, %v767_v2 }
 0x27b   : > { %v1427_v8 = vpop.eup %1426  ;;  %v768_v12 = vmul.f32 %v1425_v6, %v1611_v47 }
 0x27c   : > { %v946_v9 = vmul.f32 %v777_v31, %v769_v7  ;;  %v770_v10 = vmul.f32 %v1427_v8, %v1621_v53  ;;  %v952_v16 = vsel %vm686_vm1, %v944_v14, 0.0 }
 0x27d   : > { %v1429_v11 = vpop.eup %1428  ;;  %1345 = vmatpush3.xpose.msk.msra.mxu0 %vm686_vm1, %v777_v31  ;;  %1375 = vmatpush3.xpose.msk.msra.mxu1 %vm686_vm1, %v777_v31  ;;  %v945_v47 = vmul.f32 %v776_v44, %v768_v12 }
 0x27e   : > { %1346 = vmatprep.subr.msk.mxu0 %vm686_vm1, %v776_v44  ;;  %1368 = vmatprep.subr.msk.mxu1 %vm686_vm1, %v776_v44  ;;  %v958_v50 = vsel %vm686_vm1, %v946_v9, 0.0  ;;  %v771_v38 = vmul.f32 %v1429_v11, %v1626_v56  ;;  %v947_v13 = vmul.f32 %v778_v63, %v770_v10 }
 0x27f   : > { %959 = vadd.xlane.f32.xlu0 %v958_v50  ;;  %v955_v21 = vsel %vm686_vm1, %v945_v47, 0.0 }
 0x280   : > { %1356 = vmatprep.mubr.msk.f32.mxu1 %vm686_vm1, %v771_v38  ;;  %v961_v41 = vsel %vm686_vm1, %v947_v13, 0.0  ;;  %v948_v22 = vmul.f32 %v1684_v29, %v771_v38 }
 0x281   : > { %v1431_v53 = vpop.eup %1430  ;;  %1347 = vmatpush3.xpose.msk.msra.mxu0 %vm686_vm1, %v776_v44  ;;  %1376 = vmatpush3.xpose.msk.msra.mxu1 %vm686_vm1, %v776_v44 }
 0x282   : > { %v1433_v15 = vpop.eup %1432  ;;  %962 = vadd.xlane.f32.xlu1 %v961_v41  ;;  %1348 = vmatprep.subr.msk.mxu0 %vm686_vm1, %v775_v35  ;;  %v773_v56 = vmul.f32 %v1431_v53, %v1636_v62 }
 0x283   : > { %v1435_v17 = vpop.eup %1434  ;;  %1369 = vmatprep.subr.msk.mxu1 %vm686_vm1, %v775_v35  ;;  %953 = vadd.xlane.f32.xlu0 %v952_v16  ;;  %v772_v20 = vmul.f32 %v1433_v15, %v1631_v59 }
 0x284   : > { %v774_v18 = vmul.f32 %v1435_v17, %v1641_v1  ;;  %v950_v19 = vmul.f32 %v1666_v43, %v773_v56  ;;  %v964_v1 = vsel %vm686_vm1, %v948_v22, 0.0 }
 0x285   : > { %1349 = vmatpush3.xpose.msk.msra.mxu0 %vm686_vm1, %v775_v35  ;;  %1377 = vmatpush3.xpose.msk.msra.mxu1 %vm686_vm1, %v775_v35  ;;  %v949_v59 = vmul.f32 %v1673_v48, %v772_v20 }
 0x286   : > { %956 = vadd.xlane.f32.xlu1 %v955_v21  ;;  %v951_v62 = vmul.f32 %v1655_v33, %v774_v18  ;;  %v970_v45 = vsel %vm686_vm1, %v950_v19, 0.0 }
 0x287   : > { %v967_v23 = vsel %vm686_vm1, %v949_v59, 0.0 }
 0x288   : > { %1351 = vmatmul.mubr.msk.f32.vlgmr.msra.gmra.mxu0 %vm686_vm1, %v768_v12  ;;  %1357 = vmatmul.mubr.msk.f32.vlgmr.msra.gmra.mxu1 %vm686_vm1, %v772_v20  ;;  %v973_v51 = vsel %vm686_vm1, %v951_v62, 0.0 }
 0x289   : > { %1353 = vmatprep.mubr.msk.f32.mxu0 %vm686_vm1, %v769_v7  ;;  %1359 = vmatprep.mubr.msk.f32.mxu1 %vm686_vm1, %v773_v56 }
 0x28a   : > { %965 = vadd.xlane.f32.xlu1 %v964_v1 }
 0x28c   : > { %1354 = vmatmul.mubr.msk.f32.gmra.mxu0 %vm686_vm1, %v770_v10  ;;  %1360 = vmatmul.mubr.msk.f32.gmra.mxu1 %vm686_vm1, %v774_v18 }
 0x28e   : > { %968 = vadd.xlane.f32.xlu1 %v967_v23 }
 0x308   : > { %v960_v63 = vpop.xlane.xlu0 %959 }
 0x309   : > { %v1785_v47 = vmul.f32 14.285714, %v960_v63 }
 0x30b   : > { %v963_v61 = vpop.xlane.xlu1 %962 }
 0x30c   : > { %v954_v2 = vpop.xlane.xlu0 %953  ;;  %v1777_v50 = vmul.f32 14.285714, %v963_v61 }
 0x30d   : > { %v1765_v5 = vmul.f32 14.285714, %v954_v2 }
 0x30f   : > { %v957_v28 = vpop.xlane.xlu1 %956 }
 0x310   : > { %v1763_v4 = vmul.f32 14.285714, %v957_v28 }
 0x313   : > { %v966_v0 = vpop.xlane.xlu1 %965 }
 0x314   : > { %v1775_v11 = vmul.f32 14.285714, %v966_v0 }
 0x317   : > { %v969_v3 = vpop.xlane.xlu1 %968 }
 0x318   : > { %v1795_v21 = vmul.f32 14.285714, %v969_v3 }
 0x348   : > { %v1352_v24 = vpop.f32.mrf.mxu0  ;;  %v1358_v27 = vpop.f32.mrf.mxu1 }
 0x349   : > { %v937_v30 = vmul.f32 14.285714, %v1352_v24  ;;  %v941_v52 = vmul.f32 14.285714, %v1358_v27 }
 0x34a   : > { %v897_v32 = vpop.f32.mrf.mxu0  ;;  %v917_v33 = vpop.f32.mrf.mxu1 }
 0x34b   : > { %v936_v34 = vmul.f32 14.285714, %v897_v32  ;;  %v1744_v36 = vmul.f32 14.285714, %v917_v33  ;;  %v987_v37 = vsel %vm364_vm0, %v937_v30, -inf  ;;  %v999_v58 = vsel %vm364_vm0, %v941_v52, -inf }
 0x34c   : > { %988 = vmax.xlane.f32.xlu0 %v987_v37  ;;  %v1355_v39 = vpop.f32.mrf.mxu0  ;;  %v1361_v46 = vpop.f32.mrf.mxu1 }
 0x34d   : > { %v984_v40 = vsel %vm364_vm0, %v936_v34, -inf  ;;  %v939_v26 = vmul.f32 14.285714, %v1355_v39  ;;  %v996_v42 = vsel %vm364_vm0, %v1744_v36, -inf  ;;  %v1752_v25 = vmul.f32 14.285714, %v1361_v46 }
 0x34e   : > { %985 = vmax.xlane.f32.xlu1 %v984_v40  ;;  %v907_v43 = vpop.f32.mrf.mxu0  ;;  %v927_v54 = vpop.f32.mrf.mxu1 }
 0x34f   : > { %v938_v48 = vmul.f32 14.285714, %v907_v43  ;;  %v993_v49 = vsel %vm364_vm0, %v939_v26, -inf  ;;  %v1005_v55 = vsel %vm364_vm0, %v1752_v25, -inf  ;;  %v1758_v57 = vmul.f32 14.285714, %v927_v54 }
 0x350   : > { %997 = vmax.xlane.f32.xlu0 %v996_v42 }
 0x351   : > { %v990_v29 = vsel %vm364_vm0, %v938_v48, -inf  ;;  %v1002_v60 = vsel %vm364_vm0, %v1758_v57, -inf }
 0x352   : > { %971 = vadd.xlane.f32.xlu1 %v970_v45 }
 0x354   : > { %994 = vmax.xlane.f32.xlu0 %v993_v49 }
 0x356   : > { %974 = vadd.xlane.f32.xlu1 %v973_v51 }
 0x358   : > { %991 = vmax.xlane.f32.xlu0 %v990_v29 }
 0x35a   : > { %1006 = vmax.xlane.f32.xlu1 %v1005_v55 }
 0x35c   : > { %1000 = vmax.xlane.f32.xlu0 %v999_v58 }
 0x360   : > { %1003 = vmax.xlane.f32.xlu0 %v1002_v60 }
 0x3d5   : > { %v989_v31 = vpop.xlane.xlu0 %988 }
 0x3d6   : > { %v1768_v6 = vmax.f32 %v989_v31, %v1763_v4 }
 0x3d7   : > { %v986_v7 = vpop.xlane.xlu1 %985 }
 0x3d8   : > { %v1017_v8 = vsub.f32 %v937_v30, %v1768_v6  ;;  %v1772_v44 = vmax.f32 %v986_v7, %v1765_v5 }
 0x3d9   : > { %v998_v9 = vpop.xlane.xlu0 %997 }
 0x3da   : > { %v1026_v10 = vmul.f32 1.442695, %v1017_v8  ;;  %v1016_v35 = vsub.f32 %v936_v34, %v1772_v44  ;;  %v1780_v13 = vmax.f32 %v998_v9, %v1775_v11 }
 0x3db   : > { %v972_v12 = vpop.xlane.xlu1 %971 }
 0x3dc   : > { %1436 = vpow2.f32 %v1026_v10  ;;  %v1024_v38 = vmul.f32 1.442695, %v1016_v35  ;;  %v1020_v16 = vsub.f32 %v1744_v36, %v1780_v13  ;;  %v1806_v30 = vmul.f32 14.285714, %v972_v12 }
 0x3dd   : > { %v995_v14 = vpop.xlane.xlu0 %994 }
 0x3de   : > { %1438 = vpow2.f32 %v1024_v38  ;;  %v1783_v41 = vmax.f32 %v995_v14, %v1777_v50  ;;  %v1032_v1 = vmul.f32 1.442695, %v1020_v16 }
 0x3df   : > { %v975_v53 = vpop.xlane.xlu1 %974 }
 0x3e0   : > { %v1019_v15 = vsub.f32 %v939_v26, %v1783_v41  ;;  %v1790_v18 = vmul.f32 14.285714, %v975_v53 }
 0x3e1   : > { %v992_v56 = vpop.xlane.xlu0 %991 }
 0x3e2   : > { %v1030_v17 = vmul.f32 1.442695, %v1019_v15  ;;  %v1793_v19 = vmax.f32 %v992_v56, %v1785_v47 }
 0x3e3   : > { %v1007_v20 = vpop.xlane.xlu1 %1006 }
 0x3e4   : > { %1440 = vpow2.f32 %v1030_v17  ;;  %v1018_v22 = vsub.f32 %v938_v48, %v1793_v19  ;;  %v1799_v62 = vmax.f32 %v1007_v20, %v1790_v18 }
 0x3e5   : > { %v1001_v59 = vpop.xlane.xlu0 %1000 }
 0x3e6   : > { %v1028_v23 = vmul.f32 1.442695, %v1018_v22  ;;  %v1023_v24 = vsub.f32 %v1752_v25, %v1799_v62  ;;  %v1804_v27 = vmax.f32 %v1001_v59, %v1795_v21 }
 0x3e8   : > { %1442 = vpow2.f32 %v1028_v23  ;;  %v1021_v32 = vsub.f32 %v941_v52, %v1804_v27  ;;  %v1038_v36 = vmul.f32 1.442695, %v1023_v24 }
 0x3e9   : > { %v1437_v33 = vpop.eup %1436  ;;  %1444 = vpow2.f32 %v1032_v1  ;;  %v1004_v34 = vpop.xlane.xlu0 %1003 }
 0x3ea   : > { %v1034_v37 = vmul.f32 1.442695, %v1021_v32  ;;  %v1810_v39 = vmax.f32 %v1004_v34, %v1806_v30  ;;  %v1043_v40 = vsel %vm364_vm0, %v1437_v33, 0.0 }
 0x3eb   : > { %v1439_v26 = vpop.eup %1438  ;;  %1044 = vadd.xlane.f32.xlu1 %v1043_v40 }
 0x3ec   : > { %1446 = vpow2.f32 %v1034_v37  ;;  %v1022_v42 = vsub.f32 %v1758_v57, %v1810_v39  ;;  %v1040_v43 = vsel %vm364_vm0, %v1439_v26, 0.0 }
 0x3ed   : > { %1041 = vadd.xlane.f32.xlu0 %v1040_v43  ;;  %1448 = vpow2.f32 %v1038_v36 }
 0x3ee   : > { %v1036_v45 = vmul.f32 1.442695, %v1022_v42 }
 0x3f0   : > { %1450 = vpow2.f32 %v1036_v45 }
 0x3f1   : > { %v1441_v46 = vpop.eup %1440 }
 0x3f2   : > { %v1049_v48 = vsel %vm364_vm0, %v1441_v46, 0.0 }
 0x3f3   : > { %1050 = vadd.xlane.f32.xlu1 %v1049_v48 }
 0x3f5   : > { %v1443_v49 = vpop.eup %1442 }
 0x3f6   : > { %v1445_v25 = vpop.eup %1444  ;;  %v1046_v51 = vsel %vm364_vm0, %v1443_v49, 0.0 }
 0x3f7   : > { %1047 = vadd.xlane.f32.xlu0 %v1046_v51  ;;  %v1052_v29 = vsel %vm364_vm0, %v1445_v25, 0.0 }
 0x3f9   : > { %v1447_v52 = vpop.eup %1446 }
 0x3fa   : > { %v1055_v54 = vsel %vm364_vm0, %v1447_v52, 0.0  ;;  %v1449_v55 = vpop.eup %1448 }
 0x3fb   : > { %1053 = vadd.xlane.f32.xlu0 %v1052_v29  ;;  %1056 = vadd.xlane.f32.xlu1 %v1055_v54  ;;  %v1061_v58 = vsel %vm364_vm0, %v1449_v55, 0.0 }
 0x3fd   : > { %v1451_v57 = vpop.eup %1450 }
 0x3fe   : > { %v1058_v60 = vsel %vm364_vm0, %v1451_v57, 0.0 }
 0x3ff   : > { %1062 = vadd.xlane.f32.xlu1 %v1061_v58  ;;  %1059 = vadd.xlane.f32.xlu0 %v1058_v60 }
 0x474   : > { %v1045_v61 = vpop.xlane.xlu1 %1044 }
 0x475   : > { %1452 = vlog2.f32 %v1045_v61 }
 0x476   : > { %v1042_v28 = vpop.xlane.xlu0 %1041 }
 0x477   : > { %1454 = vlog2.f32 %v1042_v28 }
 0x47c   : > { %v1051_v63 = vpop.xlane.xlu1 %1050 }
 0x47d   : > { %1456 = vlog2.f32 %v1051_v63 }
 0x480   : > { %v1048_v0 = vpop.xlane.xlu0 %1047 }
 0x481   : > { %1458 = vlog2.f32 %v1048_v0 }
 0x482   : > { %v1453_v2 = vpop.eup %1452 }
 0x483   : > { %v1067_v9 = vmul.f32 0.6931472, %v1453_v2 }
 0x484   : > { %v1455_v3 = vpop.eup %1454  ;;  %v1057_v31 = vpop.xlane.xlu1 %1056 }
 0x485   : > { %v1054_v7 = vpop.xlane.xlu0 %1053  ;;  %v1065_v8 = vmul.f32 0.6931472, %v1455_v3  ;;  %1460 = vlog2.f32 %v1057_v31  ;;  %v1081_v14 = vadd.f32 %v1067_v9, %v1768_v6 }
 0x486   : > { %1462 = vlog2.f32 %v1054_v7 }
 0x487   : > { %v1080_v12 = vadd.f32 %v1065_v8, %v1772_v44  ;;  %v1089_v56 = vsub.f32 %v1081_v14, %v1763_v4 }
 0x488   : > { %v1063_v10 = vpop.xlane.xlu1 %1062 }
 0x489   : > { %v1060_v35 = vpop.xlane.xlu0 %1059  ;;  %1464 = vlog2.f32 %v1063_v10  ;;  %v1088_v15 = vsub.f32 %v1080_v12, %v1765_v5  ;;  %v1098_v23 = vsel %vm1096_vm2, %v1089_v56, 0.0 }
 0x48a   : > { %v1457_v38 = vpop.eup %1456  ;;  %1466 = vlog2.f32 %v1060_v35 }
 0x48b   : > { %v1071_v53 = vmul.f32 0.6931472, %v1457_v38  ;;  %v1097_v22 = vsel %vm1096_vm2, %v1088_v15, 0.0 }
 0x48c   : > { %v1099_v32 = vadd.f32 %v1098_v23, %v1097_v22 }
 0x48d   : > { %v1083_v17 = vadd.f32 %v1071_v53, %v1783_v41 }
 0x48e   : > { %v1459_v16 = vpop.eup %1458 }
 0x48f   : > { %v1069_v20 = vmul.f32 0.6931472, %v1459_v16  ;;  %v1091_v6 = vsub.f32 %v1083_v17, %v1777_v50 }
 0x491   : > { %v1082_v1 = vadd.f32 %v1069_v20, %v1793_v19  ;;  %v1102_v40 = vsel %vm1096_vm2, %v1091_v6, 0.0 }
 0x492   : > { %v1461_v44 = vpop.eup %1460 }
 0x493   : > { %v1463_v59 = vpop.eup %1462  ;;  %v1090_v24 = vsub.f32 %v1082_v1, %v1785_v47  ;;  %v1075_v5 = vmul.f32 0.6931472, %v1461_v44 }
 0x494   : > { %v1073_v33 = vmul.f32 0.6931472, %v1463_v59 }
 0x495   : > { %v1100_v4 = vsel %vm1096_vm2, %v1090_v24, 0.0  ;;  %v1085_v41 = vadd.f32 %v1075_v5, %v1804_v27 }
 0x496   : > { %v1465_v34 = vpop.eup %1464  ;;  %v1101_v36 = vadd.f32 %v1100_v4, %v1099_v32  ;;  %v1084_v37 = vadd.f32 %v1073_v33, %v1780_v13 }
 0x497   : > { %v1467_v19 = vpop.eup %1466  ;;  %v1079_v26 = vmul.f32 0.6931472, %v1465_v34  ;;  %v1093_v42 = vsub.f32 %v1085_v41, %v1795_v21 }
 0x498   : > { %v1092_v50 = vsub.f32 %v1084_v37, %v1775_v11  ;;  %v1077_v47 = vmul.f32 0.6931472, %v1467_v19  ;;  %v1103_v43 = vadd.f32 %v1102_v40, %v1101_v36 }
 0x499   : > { %v1087_v45 = vadd.f32 %v1079_v26, %v1799_v62  ;;  %v1106_v25 = vsel %vm1096_vm2, %v1093_v42, 0.0 }
 0x49a   : > { %v1086_v46 = vadd.f32 %v1077_v47, %v1810_v39  ;;  %v1104_v27 = vsel %vm1096_vm2, %v1092_v50, 0.0 }
 0x49b   : > { %v1105_v48 = vadd.f32 %v1104_v27, %v1103_v43  ;;  %v1095_v13 = vsub.f32 %v1087_v45, %v1790_v18 }
 0x49c   : > { %v1094_v49 = vsub.f32 %v1086_v46, %v1806_v30 }
 0x49d   : > { %v1107_v51 = vadd.f32 %v1106_v25, %v1105_v48  ;;  %v1110_v52 = vsel %vm1096_vm2, %v1095_v13, 0.0 }
 0x49e   : > { %v1108_v21 = vsel %vm1096_vm2, %v1094_v49, 0.0 }
 0x49f   : > { %v1109_v11 = vadd.f32 %v1108_v21, %v1107_v51 }
 0x4a1   : > { %v1111_v29 = vadd.f32 %v1110_v52, %v1109_v11 }
 0x4a3   : > { %1112 = vadd.xlane.f32.xlu0 %v1111_v29 }
 0x52c   : > { %v1113_v62 = vpop.xlane.xlu0 %1112 }
 0x52d   : > { %v1114_v39 = vrot.slane %v1113_v62, 4 }
 0x52f   : > { %v1115_v54 = vadd.f32 %v1114_v39, %v1113_v62 }
 0x531   : > { %v1116_v55 = vrot.slane %v1115_v54, 2 }
 0x533   : > { %v1117_v57 = vadd.f32 %v1116_v55, %v1115_v54 }
 0x535   : > { %v1118_v58 = vrot.slane %v1117_v57, 1 }
 0x537   : > { %v1119_v30 = vadd.f32 %v1118_v58, %v1117_v57 }
 0x539   : > { %1378 = vpush %v1119_v30 }
 0x56a   : > { %s1379_s7 = spop %1378 }
 0x56b   : > { %v1121_v18 = vstv %s1379_s7 }
 0x56c   : > { %1123 = vst.msk [vmem:[%s267_s30] sm:$0x1] %vm1122_vm3, %v1121_v18 }
 0x56d PF: > { %s16_s21 = sadd.s32 1, %s1474_s21  }
 0x56e   : > { %p13_p4 = scmp.ge.s32.totalorder %s16_s21, 4  }
 0x570   :  { %15 = sbr.rel (!%p13_p4) target bundleno = 1 (0x1), region = 77 }

</bundles_post_ra>
